<compile_context>
chip_gen: v5e
topology: v5e:2x2
jax: 0.10.0
libtpu: 0.0.40
codegen_flags: <defaults>
</compile_context>

<pallas_src>
import functools
import math

import jax
import jax.numpy as jnp
from jax.experimental import pallas as pl
from jax.experimental.pallas import tpu as pltpu

LANE = 128                      # lane-dense output width / packed-vector row width
MATMUL_DTYPE = jnp.float32      # set to jnp.bfloat16 on v5e/v6e/v7x for ~2x MXU
                                # throughput (f32 accumulation kept; operand rounding
                                # changes, so loosen any golden-comparison tolerances)


# ----------------------------------------------------------------------------
# In-kernel building blocks (pure functions traced inside the Pallas kernel)
# ----------------------------------------------------------------------------
def _mm(a, b, trans_b=False):
    """2-D matmul on the MXU; optional rhs-transposed contraction (no explicit k.T)."""
    dn = (((1,), (1 if trans_b else 0,)), ((), ()))
    return jax.lax.dot_general(
        a.astype(MATMUL_DTYPE), b.astype(MATMUL_DTYPE), dn,
        preferred_element_type=jnp.float32)


def _layernorm(x, g, b, eps=1e-5):
    mean = jnp.mean(x, axis=-1, keepdims=True)
    var = jnp.mean((x - mean) ** 2, axis=-1, keepdims=True)
    return (x - mean) * jax.lax.rsqrt(var + eps) * g + b


def _softmax_lastdim(s):
    # Exact normalization (no approx reciprocal) to preserve f32 module semantics.
    s = s - jnp.max(s, axis=-1, keepdims=True)
    p = jnp.exp(s)
    return p / jnp.sum(p, axis=-1, keepdims=True)


def _mha(q, k, v, wo, bo, num_heads, causal):
    """q: (Sq, D), k/v: (Sk, D).  All heads in this grid step; single Wo matmul."""
    Sq, D = q.shape
    Sk = k.shape[0]
    Dh = D // num_heads
    scale = 1.0 / math.sqrt(Dh)
    if causal:
        qi = jax.lax.broadcasted_iota(jnp.int32, (Sq, Sk), 0)
        ki = jax.lax.broadcasted_iota(jnp.int32, (Sq, Sk), 1)
        causal_mask = ki <= qi               # built once, reused per head
    col = jax.lax.broadcasted_iota(jnp.int32, (1, D), 1)
    o = jnp.zeros((Sq, D), jnp.float32)
    # TODO(synk): collapse this head loop into one batched dot_general / block-diagonal
    # K,V packing and a flash-style tiled Sk loop before scaling S, D (v7x VMEM=64MiB).
    for h in range(num_heads):
        lo, hi = h * Dh, (h + 1) * Dh
        s = _mm(q[:, lo:hi], k[:, lo:hi], trans_b=True) * scale   # (Sq, Sk)
        if causal:
            s = jnp.where(causal_mask, s, -1e30)
        p = _softmax_lastdim(s)
        # Head h's context lands exactly in columns [lo, hi) of the full-width slab
        # (masked V columns contribute exact zeros) -> one shared Wo matmul, no per-head
        # Wo fold and no lane-dim concatenation.
        vh = jnp.where((col >= lo) & (col < hi), v, 0.0)
        o = o + _mm(p, vh)                                        # (Sq, D)
    return _mm(o, wo) + bo


# ----------------------------------------------------------------------------
# Single fused encoder+decoder kernel (grid over batch only)
# ----------------------------------------------------------------------------
def _sttre_fused_kernel(x_ref, h_ref,
                        e_emb_w, e_wqkv, e_wo, e_w1, e_w2, e_vec,
                        d_emb_w, d_sa_wqkv, d_sa_wo, d_ca_wq, d_ca_wkv, d_ca_wo,
                        d_w1, d_w2, d_out_w, d_vec,
                        out_ref, *, num_heads, d_model, d_ff):
    D, Dff = d_model, d_ff
    ev = e_vec[...]                                   # (11, LANE) packed encoder vectors
    dv = d_vec[...]                                   # (18, LANE) packed decoder vectors

    def row(vec, i, w=D):                             # (1, w) broadcast row
        return vec[i:i + 1, 0:w]

    def self_attn(x, wqkv, bq, bk, bv, wo, bo, causal):
        qkv = _mm(x, wqkv)                            # fused Q|K|V projection
        q = qkv[:, 0:D] + bq
        k = qkv[:, D:2 * D] + bk
        v = qkv[:, 2 * D:3 * D] + bv
        return _mha(q, k, v, wo, bo, num_heads, causal)

    def cross_attn(y, mem, wq, bq, wkv, bk, bv, wo, bo):
        q = _mm(y, wq) + bq
        kv = _mm(mem, wkv)                            # fused K|V projection
        k = kv[:, 0:D] + bk
        v = kv[:, D:2 * D] + bv
        return _mha(q, k, v, wo, bo, num_heads, causal=False)

    def ffn(x, w1, b1, w2, b2):
        hidden = jnp.maximum(_mm(x, w1) + b1, 0.0)
        return _mm(hidden, w2) + b2

    # -------- encoder layer: memory never leaves VMEM/vregs --------
    x = x_ref[0].astype(jnp.float32)                  # (S, Fx)
    h = _mm(x, e_emb_w[...]) + row(ev, 0)             # embedding
    a = self_attn(h, e_wqkv[...], row(ev, 1), row(ev, 2), row(ev, 3),
                  e_wo[...], row(ev, 4), causal=False)
    h = _layernorm(h + a, row(ev, 5), row(ev, 6))     # residual fused into LN
    f = ffn(h, e_w1[...], row(ev, 7, Dff), e_w2[...], row(ev, 8))
    mem = _layernorm(h + f, row(ev, 9), row(ev, 10))  # (S, D) encoder memory (in VMEM)

    # -------- decoder layer --------
    y = h_ref[0].astype(jnp.float32)                  # (T, Fh)
    y = _mm(y, d_emb_w[...]) + row(dv, 0)
    a = self_attn(y, d_sa_wqkv[...], row(dv, 1), row(dv, 2), row(dv, 3),
                  d_sa_wo[...], row(dv, 4), causal=True)
    y = _layernorm(y + a, row(dv, 5), row(dv, 6))
    c = cross_attn(y, mem, d_ca_wq[...], row(dv, 7), d_ca_wkv[...],
                   row(dv, 8), row(dv, 9), d_ca_wo[...], row(dv, 10))
    y = _layernorm(y + c, row(dv, 11), row(dv, 12))
    f = ffn(y, d_w1[...], row(dv, 13, Dff), d_w2[...], row(dv, 14))
    y = _layernorm(y + f, row(dv, 15), row(dv, 16))
    # Lane-dense final projection: out_w is zero-padded (D, LANE); sliced outside.
    out_ref[0] = (_mm(y, d_out_w[...]) + row(dv, 17, LANE)).astype(out_ref.dtype)


# ----------------------------------------------------------------------------
# Module forward (mirrors the PyTorch wrapper's reshape/transpose glue)
# ----------------------------------------------------------------------------
def transformer_forward(params, X, H, *, num_heads, out_dim):
    # X = X.reshape(B, -1, X.shape[2]).transpose(2, 1); same for H.
    X = jnp.transpose(X.reshape(X.shape[0], -1, X.shape[2]), (0, 2, 1))   # (B, S, Fx)
    H = jnp.transpose(H.reshape(H.shape[0], -1, H.shape[2]), (0, 2, 1))   # (B, T, Fh)
    B, S, Fx = X.shape
    _, T, Fh = H.shape
    enc, dec = params["encoder"], params["decoder"]
    weights = [enc["emb_w"], enc["wqkv"], enc["wo"], enc["w1"], enc["w2"], enc["vec"],
               dec["emb_w"], dec["sa_wqkv"], dec["sa_wo"], dec["ca_wq"], dec["ca_wkv"],
               dec["ca_wo"], dec["w1"], dec["w2"], dec["out_w"], dec["vec"]]
    D = enc["emb_w"].shape[1]
    Dff = enc["w1"].shape[1]
    kern = functools.partial(_sttre_fused_kernel, num_heads=num_heads,
                             d_model=D, d_ff=Dff)
    wspecs = [pl.BlockSpec(w.shape, lambda b, n=w.ndim: (0,) * n) for w in weights]
    out_padded = pl.pallas_call(
        kern,
        out_shape=jax.ShapeDtypeStruct((B, T, LANE), jnp.float32),
        grid=(B,),
        in_specs=[pl.BlockSpec((1, S, Fx), lambda b: (b, 0, 0)),
                  pl.BlockSpec((1, T, Fh), lambda b: (b, 0, 0))] + wspecs,
        out_specs=pl.BlockSpec((1, T, LANE), lambda b: (b, 0, 0)),
        compiler_params=pltpu.CompilerParams(dimension_semantics=("parallel",)),
    )(X, H, *weights)
    return out_padded[..., :out_dim]                                      # (B, T, out_dim)


# ----------------------------------------------------------------------------
# Deterministic parameter construction (weights pre-fused, vectors pre-packed)
# ----------------------------------------------------------------------------
def _pack_rows(vectors, width):
    rows = []
    for v in vectors:
        v = jnp.asarray(v, jnp.float32).reshape(-1)
        rows.append(jnp.pad(v, (0, width - v.shape[0])))
    return jnp.stack(rows, axis=0)


def make_params(key, Fx, Fh, D, Dff, out_dim):
    ks = jax.random.split(key, 16)

    def init(k, shape, scale=0.02):
        return (scale * jax.random.normal(k, shape)).astype(jnp.float32)

    def fused_qkv(k):
        k1, k2, k3 = jax.random.split(k, 3)
        return jnp.concatenate([init(k1, (D, D)), init(k2, (D, D)), init(k3, (D, D))],
                               axis=1)

    zD = jnp.zeros((D,), jnp.float32)
    oD = jnp.ones((D,), jnp.float32)
    zF = jnp.zeros((Dff,), jnp.float32)

    enc = {
        "emb_w": init(ks[0], (Fx, D)),
        "wqkv": fused_qkv(ks[1]),
        "wo": init(ks[2], (D, D)),
        "w1": init(ks[3], (D, Dff)),
        "w2": init(ks[4], (Dff, D)),
        # rows: emb_b, bq, bk, bv, bo, ln1_g, ln1_b, b1(Dff), b2, ln2_g, ln2_b
        "vec": _pack_rows([zD, zD, zD, zD, zD, oD, zD, zF, zD, oD, zD], LANE),
    }

    ca_k1, ca_k2 = jax.random.split(ks[9], 2)
    # final projection padded out_dim -> LANE for a lane-dense store; sliced outside.
    out_w = jnp.concatenate([init(ks[13], (D, out_dim)),
                             jnp.zeros((D, LANE - out_dim), jnp.float32)], axis=1)
    dec = {
        "emb_w": init(ks[5], (Fh, D)),
        "sa_wqkv": fused_qkv(ks[6]),
        "sa_wo": init(ks[7], (D, D)),
        "ca_wq": init(ks[8], (D, D)),
        "ca_wkv": jnp.concatenate([init(ca_k1, (D, D)), init(ca_k2, (D, D))], axis=1),
        "ca_wo": init(ks[10], (D, D)),
        "w1": init(ks[11], (D, Dff)),
        "w2": init(ks[12], (Dff, D)),
        "out_w": out_w,
        # rows: emb_b, sa_bq, sa_bk, sa_bv, sa_bo, ln1_g, ln1_b,
        #       ca_bq, ca_bk, ca_bv, ca_bo, ln2_g, ln2_b,
        #       b1(Dff), b2, ln3_g, ln3_b, out_b(LANE)
        "vec": _pack_rows([zD, zD, zD, zD, zD, oD, zD,
                           zD, zD, zD, zD, oD, zD,
                           zF, zD, oD, zD,
                           jnp.zeros((LANE,), jnp.float32)], LANE),
    }
    return {"encoder": enc, "decoder": dec}


if __name__ == "__main__":
    B, Fx, Fh, S, T = 2, 4, 4, 8, 8            # inputs are (batch, features, seq)
    D, Dff, num_heads, out_dim = 32, 64, 4, 1

    key = jax.random.PRNGKey(0)
    kx, kh, kp = jax.random.split(key, 3)
    X = jax.random.normal(kx, (B, Fx, S), dtype=jnp.float32)
    H = jax.random.normal(kh, (B, Fh, T), dtype=jnp.float32)
    params = make_params(kp, Fx, Fh, D, Dff, out_dim)

    fwd = jax.jit(functools.partial(transformer_forward,
                                    num_heads=num_heads, out_dim=out_dim))
    out = fwd(params, X, H)
    jax.block_until_ready(out)
    assert out.shape == (B, T, out_dim)
    print("KERNEL_OK")
</pallas_src>

<mosaic_0001>
module attributes {stable_mosaic.version = 11 : i64} {
  func.func @_sttre_fused_kernel(%arg0: i32, %arg1: memref<1x8x4xf32, #tpu.memory_space<vmem>>, %arg2: memref<1x8x4xf32, #tpu.memory_space<vmem>>, %arg3: memref<4x32xf32, #tpu.memory_space<vmem>>, %arg4: memref<32x96xf32, #tpu.memory_space<vmem>>, %arg5: memref<32x32xf32, #tpu.memory_space<vmem>>, %arg6: memref<32x64xf32, #tpu.memory_space<vmem>>, %arg7: memref<64x32xf32, #tpu.memory_space<vmem>>, %arg8: memref<11x128xf32, #tpu.memory_space<vmem>>, %arg9: memref<4x32xf32, #tpu.memory_space<vmem>>, %arg10: memref<32x96xf32, #tpu.memory_space<vmem>>, %arg11: memref<32x32xf32, #tpu.memory_space<vmem>>, %arg12: memref<32x32xf32, #tpu.memory_space<vmem>>, %arg13: memref<32x64xf32, #tpu.memory_space<vmem>>, %arg14: memref<32x32xf32, #tpu.memory_space<vmem>>, %arg15: memref<32x64xf32, #tpu.memory_space<vmem>>, %arg16: memref<64x32xf32, #tpu.memory_space<vmem>>, %arg17: memref<32x128xf32, #tpu.memory_space<vmem>>, %arg18: memref<18x128xf32, #tpu.memory_space<vmem>>, %arg19: memref<1x8x128xf32, #tpu.memory_space<vmem>>) attributes {dimension_semantics = [#tpu.dimension_semantics<parallel>], iteration_bounds = array<i64: 2>, scalar_prefetch = 0 : i64, scratch_operands = 0 : i64, tpu.core_type = #tpu.core_type<tc>, window_params = [{transform_indices = @transform_0, window_bounds = array<i64: 1, 8, 4>}, {transform_indices = @transform_1, window_bounds = array<i64: 1, 8, 4>}, {pipeline_mode = #tpu.pipeline_mode<synchronous>, transform_indices = @transform_2, window_bounds = array<i64: 4, 32>}, {pipeline_mode = #tpu.pipeline_mode<synchronous>, transform_indices = @transform_3, window_bounds = array<i64: 32, 96>}, {pipeline_mode = #tpu.pipeline_mode<synchronous>, transform_indices = @transform_4, window_bounds = array<i64: 32, 32>}, {pipeline_mode = #tpu.pipeline_mode<synchronous>, transform_indices = @transform_5, window_bounds = array<i64: 32, 64>}, {pipeline_mode = #tpu.pipeline_mode<synchronous>, transform_indices = @transform_6, window_bounds = array<i64: 64, 32>}, {pipeline_mode = #tpu.pipeline_mode<synchronous>, transform_indices = @transform_7, window_bounds = array<i64: 11, 128>}, {pipeline_mode = #tpu.pipeline_mode<synchronous>, transform_indices = @transform_8, window_bounds = array<i64: 4, 32>}, {pipeline_mode = #tpu.pipeline_mode<synchronous>, transform_indices = @transform_9, window_bounds = array<i64: 32, 96>}, {pipeline_mode = #tpu.pipeline_mode<synchronous>, transform_indices = @transform_10, window_bounds = array<i64: 32, 32>}, {pipeline_mode = #tpu.pipeline_mode<synchronous>, transform_indices = @transform_11, window_bounds = array<i64: 32, 32>}, {pipeline_mode = #tpu.pipeline_mode<synchronous>, transform_indices = @transform_12, window_bounds = array<i64: 32, 64>}, {pipeline_mode = #tpu.pipeline_mode<synchronous>, transform_indices = @transform_13, window_bounds = array<i64: 32, 32>}, {pipeline_mode = #tpu.pipeline_mode<synchronous>, transform_indices = @transform_14, window_bounds = array<i64: 32, 64>}, {pipeline_mode = #tpu.pipeline_mode<synchronous>, transform_indices = @transform_15, window_bounds = array<i64: 64, 32>}, {pipeline_mode = #tpu.pipeline_mode<synchronous>, transform_indices = @transform_16, window_bounds = array<i64: 32, 128>}, {pipeline_mode = #tpu.pipeline_mode<synchronous>, transform_indices = @transform_17, window_bounds = array<i64: 18, 128>}, {transform_indices = @transform_18, window_bounds = array<i64: 1, 8, 128>}]} {
    %c0 = arith.constant 0 : index
    %c0_0 = arith.constant 0 : index
    %0 = vector.load %arg8[%c0, %c0_0] : memref<11x128xf32, #tpu.memory_space<vmem>>, vector<11x128xf32>
    %c0_1 = arith.constant 0 : index
    %c0_2 = arith.constant 0 : index
    %1 = vector.load %arg18[%c0_1, %c0_2] : memref<18x128xf32, #tpu.memory_space<vmem>>, vector<18x128xf32>
    %c0_3 = arith.constant 0 : index
    %c0_4 = arith.constant 0 : index
    %c0_5 = arith.constant 0 : index
    %2 = vector.load %arg1[%c0_3, %c0_4, %c0_5] : memref<1x8x4xf32, #tpu.memory_space<vmem>>, vector<1x8x4xf32>
    %3 = vector.shape_cast %2 : vector<1x8x4xf32> to vector<8x4xf32>
    %c0_6 = arith.constant 0 : index
    %c0_7 = arith.constant 0 : index
    %4 = vector.load %arg3[%c0_6, %c0_7] : memref<4x32xf32, #tpu.memory_space<vmem>>, vector<4x32xf32>
    %cst = arith.constant dense<0.000000e+00> : vector<8x32xf32>
    %5 = tpu.matmul %3, %4, %cst {dimension_numbers = #tpu.dot_dimension_numbers<[1], [0], [0], [1], [0, 0, 1, 1], [], []>} : vector<8x4xf32>, vector<4x32xf32>, vector<8x32xf32> -> vector<8x32xf32>
    %6 = vector.extract_strided_slice %0 {offsets = [0, 0], sizes = [1, 32], strides = [1, 1]} : vector<11x128xf32> to vector<1x32xf32>
    %7 = vector.broadcast %6 : vector<1x32xf32> to vector<8x32xf32>
    %8 = arith.addf %5, %7 : vector<8x32xf32>
    %c0_8 = arith.constant 0 : index
    %c0_9 = arith.constant 0 : index
    %9 = vector.load %arg4[%c0_8, %c0_9] : memref<32x96xf32, #tpu.memory_space<vmem>>, vector<32x96xf32>
    %10 = vector.extract_strided_slice %0 {offsets = [1, 0], sizes = [1, 32], strides = [1, 1]} : vector<11x128xf32> to vector<1x32xf32>
    %11 = vector.extract_strided_slice %0 {offsets = [2, 0], sizes = [1, 32], strides = [1, 1]} : vector<11x128xf32> to vector<1x32xf32>
    %12 = vector.extract_strided_slice %0 {offsets = [3, 0], sizes = [1, 32], strides = [1, 1]} : vector<11x128xf32> to vector<1x32xf32>
    %c0_10 = arith.constant 0 : index
    %c0_11 = arith.constant 0 : index
    %13 = vector.load %arg5[%c0_10, %c0_11] : memref<32x32xf32, #tpu.memory_space<vmem>>, vector<32x32xf32>
    %14 = vector.extract_strided_slice %0 {offsets = [4, 0], sizes = [1, 32], strides = [1, 1]} : vector<11x128xf32> to vector<1x32xf32>
    %cst_12 = arith.constant dense<0.000000e+00> : vector<8x96xf32>
    %15 = tpu.matmul %8, %9, %cst_12 {dimension_numbers = #tpu.dot_dimension_numbers<[1], [0], [0], [1], [0, 0, 1, 1], [], []>} : vector<8x32xf32>, vector<32x96xf32>, vector<8x96xf32> -> vector<8x96xf32>
    %16 = vector.extract_strided_slice %15 {offsets = [0, 0], sizes = [8, 32], strides = [1, 1]} : vector<8x96xf32> to vector<8x32xf32>
    %17 = vector.broadcast %10 : vector<1x32xf32> to vector<8x32xf32>
    %18 = arith.addf %16, %17 : vector<8x32xf32>
    %19 = vector.extract_strided_slice %15 {offsets = [0, 32], sizes = [8, 32], strides = [1, 1]} : vector<8x96xf32> to vector<8x32xf32>
    %20 = vector.broadcast %11 : vector<1x32xf32> to vector<8x32xf32>
    %21 = arith.addf %19, %20 : vector<8x32xf32>
    %22 = vector.extract_strided_slice %15 {offsets = [0, 64], sizes = [8, 32], strides = [1, 1]} : vector<8x96xf32> to vector<8x32xf32>
    %23 = vector.broadcast %12 : vector<1x32xf32> to vector<8x32xf32>
    %24 = arith.addf %22, %23 : vector<8x32xf32>
    %25 = tpu.iota {dimensions = array<i32: 1>} : vector<1x32xi32>
    %cst_13 = arith.constant 0.000000e+00 : f32
    %26 = vector.broadcast %cst_13 : f32 to vector<8x32xf32>
    %27 = vector.extract_strided_slice %18 {offsets = [0, 0], sizes = [8, 8], strides = [1, 1]} : vector<8x32xf32> to vector<8x8xf32>
    %28 = vector.extract_strided_slice %21 {offsets = [0, 0], sizes = [8, 8], strides = [1, 1]} : vector<8x32xf32> to vector<8x8xf32>
    %cst_14 = arith.constant dense<0.000000e+00> : vector<8x8xf32>
    %29 = tpu.matmul %27, %28, %cst_14 {dimension_numbers = #tpu.dot_dimension_numbers<[1], [1], [0], [0], [0, 0, 1, 0], [], []>} : vector<8x8xf32>, vector<8x8xf32>, vector<8x8xf32> -> vector<8x8xf32>
    %cst_15 = arith.constant 0.353553385 : f32
    %30 = vector.broadcast %cst_15 : f32 to vector<8x8xf32>
    %31 = arith.mulf %29, %30 : vector<8x8xf32>
    %cst_16 = arith.constant dense<0xFF800000> : vector<8xf32>
    %32 = vector.multi_reduction <maximumf>, %31, %cst_16 [1] : vector<8x8xf32> to vector<8xf32>
    %33 = vector.shape_cast %32 : vector<8xf32> to vector<8x1xf32>
    %34 = vector.broadcast %33 : vector<8x1xf32> to vector<8x8xf32>
    %35 = arith.subf %31, %34 : vector<8x8xf32>
    %36 = math.exp %35 : vector<8x8xf32>
    %cst_17 = arith.constant dense<0.000000e+00> : vector<8xf32>
    %37 = vector.multi_reduction <add>, %36, %cst_17 [1] : vector<8x8xf32> to vector<8xf32>
    %38 = vector.shape_cast %37 : vector<8xf32> to vector<8x1xf32>
    %39 = vector.broadcast %38 : vector<8x1xf32> to vector<8x8xf32>
    %40 = arith.divf %36, %39 : vector<8x8xf32>
    %c0_i32 = arith.constant 0 : i32
    %41 = vector.broadcast %c0_i32 : i32 to vector<1x32xi32>
    %42 = arith.cmpi sge, %25, %41 : vector<1x32xi32>
    %c8_i32 = arith.constant 8 : i32
    %43 = vector.broadcast %c8_i32 : i32 to vector<1x32xi32>
    %44 = arith.cmpi slt, %25, %43 : vector<1x32xi32>
    %45 = arith.andi %42, %44 : vector<1x32xi1>
    %cst_18 = arith.constant 0.000000e+00 : f32
    %46 = vector.shape_cast %45 : vector<1x32xi1> to vector<1x32xi1>
    %47 = vector.broadcast %46 : vector<1x32xi1> to vector<8x32xi1>
    %48 = vector.broadcast %cst_18 : f32 to vector<8x32xf32>
    %49 = arith.select %47, %24, %48 : vector<8x32xi1>, vector<8x32xf32>
    %cst_19 = arith.constant dense<0.000000e+00> : vector<8x32xf32>
    %50 = tpu.matmul %40, %49, %cst_19 {dimension_numbers = #tpu.dot_dimension_numbers<[1], [0], [0], [1], [0, 0, 1, 1], [], []>} : vector<8x8xf32>, vector<8x32xf32>, vector<8x32xf32> -> vector<8x32xf32>
    %51 = arith.addf %26, %50 : vector<8x32xf32>
    %52 = vector.extract_strided_slice %18 {offsets = [0, 8], sizes = [8, 8], strides = [1, 1]} : vector<8x32xf32> to vector<8x8xf32>
    %53 = vector.extract_strided_slice %21 {offsets = [0, 8], sizes = [8, 8], strides = [1, 1]} : vector<8x32xf32> to vector<8x8xf32>
    %cst_20 = arith.constant dense<0.000000e+00> : vector<8x8xf32>
    %54 = tpu.matmul %52, %53, %cst_20 {dimension_numbers = #tpu.dot_dimension_numbers<[1], [1], [0], [0], [0, 0, 1, 0], [], []>} : vector<8x8xf32>, vector<8x8xf32>, vector<8x8xf32> -> vector<8x8xf32>
    %cst_21 = arith.constant 0.353553385 : f32
    %55 = vector.broadcast %cst_21 : f32 to vector<8x8xf32>
    %56 = arith.mulf %54, %55 : vector<8x8xf32>
    %cst_22 = arith.constant dense<0xFF800000> : vector<8xf32>
    %57 = vector.multi_reduction <maximumf>, %56, %cst_22 [1] : vector<8x8xf32> to vector<8xf32>
    %58 = vector.shape_cast %57 : vector<8xf32> to vector<8x1xf32>
    %59 = vector.broadcast %58 : vector<8x1xf32> to vector<8x8xf32>
    %60 = arith.subf %56, %59 : vector<8x8xf32>
    %61 = math.exp %60 : vector<8x8xf32>
    %cst_23 = arith.constant dense<0.000000e+00> : vector<8xf32>
    %62 = vector.multi_reduction <add>, %61, %cst_23 [1] : vector<8x8xf32> to vector<8xf32>
    %63 = vector.shape_cast %62 : vector<8xf32> to vector<8x1xf32>
    %64 = vector.broadcast %63 : vector<8x1xf32> to vector<8x8xf32>
    %65 = arith.divf %61, %64 : vector<8x8xf32>
    %c8_i32_24 = arith.constant 8 : i32
    %66 = vector.broadcast %c8_i32_24 : i32 to vector<1x32xi32>
    %67 = arith.cmpi sge, %25, %66 : vector<1x32xi32>
    %c16_i32 = arith.constant 16 : i32
    %68 = vector.broadcast %c16_i32 : i32 to vector<1x32xi32>
    %69 = arith.cmpi slt, %25, %68 : vector<1x32xi32>
    %70 = arith.andi %67, %69 : vector<1x32xi1>
    %cst_25 = arith.constant 0.000000e+00 : f32
    %71 = vector.shape_cast %70 : vector<1x32xi1> to vector<1x32xi1>
    %72 = vector.broadcast %71 : vector<1x32xi1> to vector<8x32xi1>
    %73 = vector.broadcast %cst_25 : f32 to vector<8x32xf32>
    %74 = arith.select %72, %24, %73 : vector<8x32xi1>, vector<8x32xf32>
    %cst_26 = arith.constant dense<0.000000e+00> : vector<8x32xf32>
    %75 = tpu.matmul %65, %74, %cst_26 {dimension_numbers = #tpu.dot_dimension_numbers<[1], [0], [0], [1], [0, 0, 1, 1], [], []>} : vector<8x8xf32>, vector<8x32xf32>, vector<8x32xf32> -> vector<8x32xf32>
    %76 = arith.addf %51, %75 : vector<8x32xf32>
    %77 = vector.extract_strided_slice %18 {offsets = [0, 16], sizes = [8, 8], strides = [1, 1]} : vector<8x32xf32> to vector<8x8xf32>
    %78 = vector.extract_strided_slice %21 {offsets = [0, 16], sizes = [8, 8], strides = [1, 1]} : vector<8x32xf32> to vector<8x8xf32>
    %cst_27 = arith.constant dense<0.000000e+00> : vector<8x8xf32>
    %79 = tpu.matmul %77, %78, %cst_27 {dimension_numbers = #tpu.dot_dimension_numbers<[1], [1], [0], [0], [0, 0, 1, 0], [], []>} : vector<8x8xf32>, vector<8x8xf32>, vector<8x8xf32> -> vector<8x8xf32>
    %cst_28 = arith.constant 0.353553385 : f32
    %80 = vector.broadcast %cst_28 : f32 to vector<8x8xf32>
    %81 = arith.mulf %79, %80 : vector<8x8xf32>
    %cst_29 = arith.constant dense<0xFF800000> : vector<8xf32>
    %82 = vector.multi_reduction <maximumf>, %81, %cst_29 [1] : vector<8x8xf32> to vector<8xf32>
    %83 = vector.shape_cast %82 : vector<8xf32> to vector<8x1xf32>
    %84 = vector.broadcast %83 : vector<8x1xf32> to vector<8x8xf32>
    %85 = arith.subf %81, %84 : vector<8x8xf32>
    %86 = math.exp %85 : vector<8x8xf32>
    %cst_30 = arith.constant dense<0.000000e+00> : vector<8xf32>
    %87 = vector.multi_reduction <add>, %86, %cst_30 [1] : vector<8x8xf32> to vector<8xf32>
    %88 = vector.shape_cast %87 : vector<8xf32> to vector<8x1xf32>
    %89 = vector.broadcast %88 : vector<8x1xf32> to vector<8x8xf32>
    %90 = arith.divf %86, %89 : vector<8x8xf32>
    %c16_i32_31 = arith.constant 16 : i32
    %91 = vector.broadcast %c16_i32_31 : i32 to vector<1x32xi32>
    %92 = arith.cmpi sge, %25, %91 : vector<1x32xi32>
    %c24_i32 = arith.constant 24 : i32
    %93 = vector.broadcast %c24_i32 : i32 to vector<1x32xi32>
    %94 = arith.cmpi slt, %25, %93 : vector<1x32xi32>
    %95 = arith.andi %92, %94 : vector<1x32xi1>
    %cst_32 = arith.constant 0.000000e+00 : f32
    %96 = vector.shape_cast %95 : vector<1x32xi1> to vector<1x32xi1>
    %97 = vector.broadcast %96 : vector<1x32xi1> to vector<8x32xi1>
    %98 = vector.broadcast %cst_32 : f32 to vector<8x32xf32>
    %99 = arith.select %97, %24, %98 : vector<8x32xi1>, vector<8x32xf32>
    %cst_33 = arith.constant dense<0.000000e+00> : vector<8x32xf32>
    %100 = tpu.matmul %90, %99, %cst_33 {dimension_numbers = #tpu.dot_dimension_numbers<[1], [0], [0], [1], [0, 0, 1, 1], [], []>} : vector<8x8xf32>, vector<8x32xf32>, vector<8x32xf32> -> vector<8x32xf32>
    %101 = arith.addf %76, %100 : vector<8x32xf32>
    %102 = vector.extract_strided_slice %18 {offsets = [0, 24], sizes = [8, 8], strides = [1, 1]} : vector<8x32xf32> to vector<8x8xf32>
    %103 = vector.extract_strided_slice %21 {offsets = [0, 24], sizes = [8, 8], strides = [1, 1]} : vector<8x32xf32> to vector<8x8xf32>
    %cst_34 = arith.constant dense<0.000000e+00> : vector<8x8xf32>
    %104 = tpu.matmul %102, %103, %cst_34 {dimension_numbers = #tpu.dot_dimension_numbers<[1], [1], [0], [0], [0, 0, 1, 0], [], []>} : vector<8x8xf32>, vector<8x8xf32>, vector<8x8xf32> -> vector<8x8xf32>
    %cst_35 = arith.constant 0.353553385 : f32
    %105 = vector.broadcast %cst_35 : f32 to vector<8x8xf32>
    %106 = arith.mulf %104, %105 : vector<8x8xf32>
    %cst_36 = arith.constant dense<0xFF800000> : vector<8xf32>
    %107 = vector.multi_reduction <maximumf>, %106, %cst_36 [1] : vector<8x8xf32> to vector<8xf32>
    %108 = vector.shape_cast %107 : vector<8xf32> to vector<8x1xf32>
    %109 = vector.broadcast %108 : vector<8x1xf32> to vector<8x8xf32>
    %110 = arith.subf %106, %109 : vector<8x8xf32>
    %111 = math.exp %110 : vector<8x8xf32>
    %cst_37 = arith.constant dense<0.000000e+00> : vector<8xf32>
    %112 = vector.multi_reduction <add>, %111, %cst_37 [1] : vector<8x8xf32> to vector<8xf32>
    %113 = vector.shape_cast %112 : vector<8xf32> to vector<8x1xf32>
    %114 = vector.broadcast %113 : vector<8x1xf32> to vector<8x8xf32>
    %115 = arith.divf %111, %114 : vector<8x8xf32>
    %c24_i32_38 = arith.constant 24 : i32
    %116 = vector.broadcast %c24_i32_38 : i32 to vector<1x32xi32>
    %117 = arith.cmpi sge, %25, %116 : vector<1x32xi32>
    %c32_i32 = arith.constant 32 : i32
    %118 = vector.broadcast %c32_i32 : i32 to vector<1x32xi32>
    %119 = arith.cmpi slt, %25, %118 : vector<1x32xi32>
    %120 = arith.andi %117, %119 : vector<1x32xi1>
    %cst_39 = arith.constant 0.000000e+00 : f32
    %121 = vector.shape_cast %120 : vector<1x32xi1> to vector<1x32xi1>
    %122 = vector.broadcast %121 : vector<1x32xi1> to vector<8x32xi1>
    %123 = vector.broadcast %cst_39 : f32 to vector<8x32xf32>
    %124 = arith.select %122, %24, %123 : vector<8x32xi1>, vector<8x32xf32>
    %cst_40 = arith.constant dense<0.000000e+00> : vector<8x32xf32>
    %125 = tpu.matmul %115, %124, %cst_40 {dimension_numbers = #tpu.dot_dimension_numbers<[1], [0], [0], [1], [0, 0, 1, 1], [], []>} : vector<8x8xf32>, vector<8x32xf32>, vector<8x32xf32> -> vector<8x32xf32>
    %126 = arith.addf %101, %125 : vector<8x32xf32>
    %cst_41 = arith.constant dense<0.000000e+00> : vector<8x32xf32>
    %127 = tpu.matmul %126, %13, %cst_41 {dimension_numbers = #tpu.dot_dimension_numbers<[1], [0], [0], [1], [0, 0, 1, 1], [], []>} : vector<8x32xf32>, vector<32x32xf32>, vector<8x32xf32> -> vector<8x32xf32>
    %128 = vector.broadcast %14 : vector<1x32xf32> to vector<8x32xf32>
    %129 = arith.addf %127, %128 : vector<8x32xf32>
    %130 = arith.addf %8, %129 : vector<8x32xf32>
    %131 = vector.extract_strided_slice %0 {offsets = [5, 0], sizes = [1, 32], strides = [1, 1]} : vector<11x128xf32> to vector<1x32xf32>
    %132 = vector.extract_strided_slice %0 {offsets = [6, 0], sizes = [1, 32], strides = [1, 1]} : vector<11x128xf32> to vector<1x32xf32>
    %cst_42 = arith.constant dense<0.000000e+00> : vector<8xf32>
    %133 = vector.multi_reduction <add>, %130, %cst_42 [1] : vector<8x32xf32> to vector<8xf32>
    %134 = vector.shape_cast %133 : vector<8xf32> to vector<8x1xf32>
    %cst_43 = arith.constant 3.200000e+01 : f32
    %135 = vector.broadcast %cst_43 : f32 to vector<8x1xf32>
    %136 = arith.divf %134, %135 : vector<8x1xf32>
    %137 = vector.broadcast %136 : vector<8x1xf32> to vector<8x32xf32>
    %138 = arith.subf %130, %137 : vector<8x32xf32>
    %139 = arith.mulf %138, %138 : vector<8x32xf32>
    %cst_44 = arith.constant dense<0.000000e+00> : vector<8xf32>
    %140 = vector.multi_reduction <add>, %139, %cst_44 [1] : vector<8x32xf32> to vector<8xf32>
    %141 = vector.shape_cast %140 : vector<8xf32> to vector<8x1xf32>
    %cst_45 = arith.constant 3.200000e+01 : f32
    %142 = vector.broadcast %cst_45 : f32 to vector<8x1xf32>
    %143 = arith.divf %141, %142 : vector<8x1xf32>
    %144 = vector.broadcast %136 : vector<8x1xf32> to vector<8x32xf32>
    %145 = arith.subf %130, %144 : vector<8x32xf32>
    %cst_46 = arith.constant 9.99999974E-6 : f32
    %146 = vector.broadcast %cst_46 : f32 to vector<8x1xf32>
    %147 = arith.addf %143, %146 : vector<8x1xf32>
    %148 = math.rsqrt %147 : vector<8x1xf32>
    %149 = vector.broadcast %148 : vector<8x1xf32> to vector<8x32xf32>
    %150 = arith.mulf %145, %149 : vector<8x32xf32>
    %151 = vector.broadcast %131 : vector<1x32xf32> to vector<8x32xf32>
    %152 = arith.mulf %150, %151 : vector<8x32xf32>
    %153 = vector.broadcast %132 : vector<1x32xf32> to vector<8x32xf32>
    %154 = arith.addf %152, %153 : vector<8x32xf32>
    %c0_47 = arith.constant 0 : index
    %c0_48 = arith.constant 0 : index
    %155 = vector.load %arg6[%c0_47, %c0_48] : memref<32x64xf32, #tpu.memory_space<vmem>>, vector<32x64xf32>
    %156 = vector.extract_strided_slice %0 {offsets = [7, 0], sizes = [1, 64], strides = [1, 1]} : vector<11x128xf32> to vector<1x64xf32>
    %c0_49 = arith.constant 0 : index
    %c0_50 = arith.constant 0 : index
    %157 = vector.load %arg7[%c0_49, %c0_50] : memref<64x32xf32, #tpu.memory_space<vmem>>, vector<64x32xf32>
    %158 = vector.extract_strided_slice %0 {offsets = [8, 0], sizes = [1, 32], strides = [1, 1]} : vector<11x128xf32> to vector<1x32xf32>
    %cst_51 = arith.constant dense<0.000000e+00> : vector<8x64xf32>
    %159 = tpu.matmul %154, %155, %cst_51 {dimension_numbers = #tpu.dot_dimension_numbers<[1], [0], [0], [1], [0, 0, 1, 1], [], []>} : vector<8x32xf32>, vector<32x64xf32>, vector<8x64xf32> -> vector<8x64xf32>
    %160 = vector.broadcast %156 : vector<1x64xf32> to vector<8x64xf32>
    %161 = arith.addf %159, %160 : vector<8x64xf32>
    %cst_52 = arith.constant 0.000000e+00 : f32
    %162 = vector.broadcast %cst_52 : f32 to vector<8x64xf32>
    %163 = arith.maximumf %161, %162 : vector<8x64xf32>
    %cst_53 = arith.constant dense<0.000000e+00> : vector<8x32xf32>
    %164 = tpu.matmul %163, %157, %cst_53 {dimension_numbers = #tpu.dot_dimension_numbers<[1], [0], [0], [1], [0, 0, 1, 1], [], []>} : vector<8x64xf32>, vector<64x32xf32>, vector<8x32xf32> -> vector<8x32xf32>
    %165 = vector.broadcast %158 : vector<1x32xf32> to vector<8x32xf32>
    %166 = arith.addf %164, %165 : vector<8x32xf32>
    %167 = arith.addf %154, %166 : vector<8x32xf32>
    %168 = vector.extract_strided_slice %0 {offsets = [9, 0], sizes = [1, 32], strides = [1, 1]} : vector<11x128xf32> to vector<1x32xf32>
    %169 = vector.extract_strided_slice %0 {offsets = [10, 0], sizes = [1, 32], strides = [1, 1]} : vector<11x128xf32> to vector<1x32xf32>
    %cst_54 = arith.constant dense<0.000000e+00> : vector<8xf32>
    %170 = vector.multi_reduction <add>, %167, %cst_54 [1] : vector<8x32xf32> to vector<8xf32>
    %171 = vector.shape_cast %170 : vector<8xf32> to vector<8x1xf32>
    %cst_55 = arith.constant 3.200000e+01 : f32
    %172 = vector.broadcast %cst_55 : f32 to vector<8x1xf32>
    %173 = arith.divf %171, %172 : vector<8x1xf32>
    %174 = vector.broadcast %173 : vector<8x1xf32> to vector<8x32xf32>
    %175 = arith.subf %167, %174 : vector<8x32xf32>
    %176 = arith.mulf %175, %175 : vector<8x32xf32>
    %cst_56 = arith.constant dense<0.000000e+00> : vector<8xf32>
    %177 = vector.multi_reduction <add>, %176, %cst_56 [1] : vector<8x32xf32> to vector<8xf32>
    %178 = vector.shape_cast %177 : vector<8xf32> to vector<8x1xf32>
    %cst_57 = arith.constant 3.200000e+01 : f32
    %179 = vector.broadcast %cst_57 : f32 to vector<8x1xf32>
    %180 = arith.divf %178, %179 : vector<8x1xf32>
    %181 = vector.broadcast %173 : vector<8x1xf32> to vector<8x32xf32>
    %182 = arith.subf %167, %181 : vector<8x32xf32>
    %cst_58 = arith.constant 9.99999974E-6 : f32
    %183 = vector.broadcast %cst_58 : f32 to vector<8x1xf32>
    %184 = arith.addf %180, %183 : vector<8x1xf32>
    %185 = math.rsqrt %184 : vector<8x1xf32>
    %186 = vector.broadcast %185 : vector<8x1xf32> to vector<8x32xf32>
    %187 = arith.mulf %182, %186 : vector<8x32xf32>
    %188 = vector.broadcast %168 : vector<1x32xf32> to vector<8x32xf32>
    %189 = arith.mulf %187, %188 : vector<8x32xf32>
    %190 = vector.broadcast %169 : vector<1x32xf32> to vector<8x32xf32>
    %191 = arith.addf %189, %190 : vector<8x32xf32>
    %c0_59 = arith.constant 0 : index
    %c0_60 = arith.constant 0 : index
    %c0_61 = arith.constant 0 : index
    %192 = vector.load %arg2[%c0_59, %c0_60, %c0_61] : memref<1x8x4xf32, #tpu.memory_space<vmem>>, vector<1x8x4xf32>
    %193 = vector.shape_cast %192 : vector<1x8x4xf32> to vector<8x4xf32>
    %c0_62 = arith.constant 0 : index
    %c0_63 = arith.constant 0 : index
    %194 = vector.load %arg9[%c0_62, %c0_63] : memref<4x32xf32, #tpu.memory_space<vmem>>, vector<4x32xf32>
    %cst_64 = arith.constant dense<0.000000e+00> : vector<8x32xf32>
    %195 = tpu.matmul %193, %194, %cst_64 {dimension_numbers = #tpu.dot_dimension_numbers<[1], [0], [0], [1], [0, 0, 1, 1], [], []>} : vector<8x4xf32>, vector<4x32xf32>, vector<8x32xf32> -> vector<8x32xf32>
    %196 = vector.extract_strided_slice %1 {offsets = [0, 0], sizes = [1, 32], strides = [1, 1]} : vector<18x128xf32> to vector<1x32xf32>
    %197 = vector.broadcast %196 : vector<1x32xf32> to vector<8x32xf32>
    %198 = arith.addf %195, %197 : vector<8x32xf32>
    %c0_65 = arith.constant 0 : index
    %c0_66 = arith.constant 0 : index
    %199 = vector.load %arg10[%c0_65, %c0_66] : memref<32x96xf32, #tpu.memory_space<vmem>>, vector<32x96xf32>
    %200 = vector.extract_strided_slice %1 {offsets = [1, 0], sizes = [1, 32], strides = [1, 1]} : vector<18x128xf32> to vector<1x32xf32>
    %201 = vector.extract_strided_slice %1 {offsets = [2, 0], sizes = [1, 32], strides = [1, 1]} : vector<18x128xf32> to vector<1x32xf32>
    %202 = vector.extract_strided_slice %1 {offsets = [3, 0], sizes = [1, 32], strides = [1, 1]} : vector<18x128xf32> to vector<1x32xf32>
    %c0_67 = arith.constant 0 : index
    %c0_68 = arith.constant 0 : index
    %203 = vector.load %arg11[%c0_67, %c0_68] : memref<32x32xf32, #tpu.memory_space<vmem>>, vector<32x32xf32>
    %204 = vector.extract_strided_slice %1 {offsets = [4, 0], sizes = [1, 32], strides = [1, 1]} : vector<18x128xf32> to vector<1x32xf32>
    %cst_69 = arith.constant dense<0.000000e+00> : vector<8x96xf32>
    %205 = tpu.matmul %198, %199, %cst_69 {dimension_numbers = #tpu.dot_dimension_numbers<[1], [0], [0], [1], [0, 0, 1, 1], [], []>} : vector<8x32xf32>, vector<32x96xf32>, vector<8x96xf32> -> vector<8x96xf32>
    %206 = vector.extract_strided_slice %205 {offsets = [0, 0], sizes = [8, 32], strides = [1, 1]} : vector<8x96xf32> to vector<8x32xf32>
    %207 = vector.broadcast %200 : vector<1x32xf32> to vector<8x32xf32>
    %208 = arith.addf %206, %207 : vector<8x32xf32>
    %209 = vector.extract_strided_slice %205 {offsets = [0, 32], sizes = [8, 32], strides = [1, 1]} : vector<8x96xf32> to vector<8x32xf32>
    %210 = vector.broadcast %201 : vector<1x32xf32> to vector<8x32xf32>
    %211 = arith.addf %209, %210 : vector<8x32xf32>
    %212 = vector.extract_strided_slice %205 {offsets = [0, 64], sizes = [8, 32], strides = [1, 1]} : vector<8x96xf32> to vector<8x32xf32>
    %213 = vector.broadcast %202 : vector<1x32xf32> to vector<8x32xf32>
    %214 = arith.addf %212, %213 : vector<8x32xf32>
    %215 = tpu.iota {dimensions = array<i32: 0>} : vector<8x8xi32>
    %216 = tpu.iota {dimensions = array<i32: 1>} : vector<8x8xi32>
    %217 = arith.cmpi sle, %216, %215 : vector<8x8xi32>
    %218 = tpu.iota {dimensions = array<i32: 1>} : vector<1x32xi32>
    %cst_70 = arith.constant 0.000000e+00 : f32
    %219 = vector.broadcast %cst_70 : f32 to vector<8x32xf32>
    %220 = vector.extract_strided_slice %208 {offsets = [0, 0], sizes = [8, 8], strides = [1, 1]} : vector<8x32xf32> to vector<8x8xf32>
    %221 = vector.extract_strided_slice %211 {offsets = [0, 0], sizes = [8, 8], strides = [1, 1]} : vector<8x32xf32> to vector<8x8xf32>
    %cst_71 = arith.constant dense<0.000000e+00> : vector<8x8xf32>
    %222 = tpu.matmul %220, %221, %cst_71 {dimension_numbers = #tpu.dot_dimension_numbers<[1], [1], [0], [0], [0, 0, 1, 0], [], []>} : vector<8x8xf32>, vector<8x8xf32>, vector<8x8xf32> -> vector<8x8xf32>
    %cst_72 = arith.constant 0.353553385 : f32
    %223 = vector.broadcast %cst_72 : f32 to vector<8x8xf32>
    %224 = arith.mulf %222, %223 : vector<8x8xf32>
    %cst_73 = arith.constant -1.000000e+30 : f32
    %225 = vector.broadcast %cst_73 : f32 to vector<8x8xf32>
    %226 = arith.select %217, %224, %225 : vector<8x8xi1>, vector<8x8xf32>
    %cst_74 = arith.constant dense<0xFF800000> : vector<8xf32>
    %227 = vector.multi_reduction <maximumf>, %226, %cst_74 [1] : vector<8x8xf32> to vector<8xf32>
    %228 = vector.shape_cast %227 : vector<8xf32> to vector<8x1xf32>
    %229 = vector.broadcast %228 : vector<8x1xf32> to vector<8x8xf32>
    %230 = arith.subf %226, %229 : vector<8x8xf32>
    %231 = math.exp %230 : vector<8x8xf32>
    %cst_75 = arith.constant dense<0.000000e+00> : vector<8xf32>
    %232 = vector.multi_reduction <add>, %231, %cst_75 [1] : vector<8x8xf32> to vector<8xf32>
    %233 = vector.shape_cast %232 : vector<8xf32> to vector<8x1xf32>
    %234 = vector.broadcast %233 : vector<8x1xf32> to vector<8x8xf32>
    %235 = arith.divf %231, %234 : vector<8x8xf32>
    %c0_i32_76 = arith.constant 0 : i32
    %236 = vector.broadcast %c0_i32_76 : i32 to vector<1x32xi32>
    %237 = arith.cmpi sge, %218, %236 : vector<1x32xi32>
    %c8_i32_77 = arith.constant 8 : i32
    %238 = vector.broadcast %c8_i32_77 : i32 to vector<1x32xi32>
    %239 = arith.cmpi slt, %218, %238 : vector<1x32xi32>
    %240 = arith.andi %237, %239 : vector<1x32xi1>
    %cst_78 = arith.constant 0.000000e+00 : f32
    %241 = vector.shape_cast %240 : vector<1x32xi1> to vector<1x32xi1>
    %242 = vector.broadcast %241 : vector<1x32xi1> to vector<8x32xi1>
    %243 = vector.broadcast %cst_78 : f32 to vector<8x32xf32>
    %244 = arith.select %242, %214, %243 : vector<8x32xi1>, vector<8x32xf32>
    %cst_79 = arith.constant dense<0.000000e+00> : vector<8x32xf32>
    %245 = tpu.matmul %235, %244, %cst_79 {dimension_numbers = #tpu.dot_dimension_numbers<[1], [0], [0], [1], [0, 0, 1, 1], [], []>} : vector<8x8xf32>, vector<8x32xf32>, vector<8x32xf32> -> vector<8x32xf32>
    %246 = arith.addf %219, %245 : vector<8x32xf32>
    %247 = vector.extract_strided_slice %208 {offsets = [0, 8], sizes = [8, 8], strides = [1, 1]} : vector<8x32xf32> to vector<8x8xf32>
    %248 = vector.extract_strided_slice %211 {offsets = [0, 8], sizes = [8, 8], strides = [1, 1]} : vector<8x32xf32> to vector<8x8xf32>
    %cst_80 = arith.constant dense<0.000000e+00> : vector<8x8xf32>
    %249 = tpu.matmul %247, %248, %cst_80 {dimension_numbers = #tpu.dot_dimension_numbers<[1], [1], [0], [0], [0, 0, 1, 0], [], []>} : vector<8x8xf32>, vector<8x8xf32>, vector<8x8xf32> -> vector<8x8xf32>
    %cst_81 = arith.constant 0.353553385 : f32
    %250 = vector.broadcast %cst_81 : f32 to vector<8x8xf32>
    %251 = arith.mulf %249, %250 : vector<8x8xf32>
    %cst_82 = arith.constant -1.000000e+30 : f32
    %252 = vector.broadcast %cst_82 : f32 to vector<8x8xf32>
    %253 = arith.select %217, %251, %252 : vector<8x8xi1>, vector<8x8xf32>
    %cst_83 = arith.constant dense<0xFF800000> : vector<8xf32>
    %254 = vector.multi_reduction <maximumf>, %253, %cst_83 [1] : vector<8x8xf32> to vector<8xf32>
    %255 = vector.shape_cast %254 : vector<8xf32> to vector<8x1xf32>
    %256 = vector.broadcast %255 : vector<8x1xf32> to vector<8x8xf32>
    %257 = arith.subf %253, %256 : vector<8x8xf32>
    %258 = math.exp %257 : vector<8x8xf32>
    %cst_84 = arith.constant dense<0.000000e+00> : vector<8xf32>
    %259 = vector.multi_reduction <add>, %258, %cst_84 [1] : vector<8x8xf32> to vector<8xf32>
    %260 = vector.shape_cast %259 : vector<8xf32> to vector<8x1xf32>
    %261 = vector.broadcast %260 : vector<8x1xf32> to vector<8x8xf32>
    %262 = arith.divf %258, %261 : vector<8x8xf32>
    %c8_i32_85 = arith.constant 8 : i32
    %263 = vector.broadcast %c8_i32_85 : i32 to vector<1x32xi32>
    %264 = arith.cmpi sge, %218, %263 : vector<1x32xi32>
    %c16_i32_86 = arith.constant 16 : i32
    %265 = vector.broadcast %c16_i32_86 : i32 to vector<1x32xi32>
    %266 = arith.cmpi slt, %218, %265 : vector<1x32xi32>
    %267 = arith.andi %264, %266 : vector<1x32xi1>
    %cst_87 = arith.constant 0.000000e+00 : f32
    %268 = vector.shape_cast %267 : vector<1x32xi1> to vector<1x32xi1>
    %269 = vector.broadcast %268 : vector<1x32xi1> to vector<8x32xi1>
    %270 = vector.broadcast %cst_87 : f32 to vector<8x32xf32>
    %271 = arith.select %269, %214, %270 : vector<8x32xi1>, vector<8x32xf32>
    %cst_88 = arith.constant dense<0.000000e+00> : vector<8x32xf32>
    %272 = tpu.matmul %262, %271, %cst_88 {dimension_numbers = #tpu.dot_dimension_numbers<[1], [0], [0], [1], [0, 0, 1, 1], [], []>} : vector<8x8xf32>, vector<8x32xf32>, vector<8x32xf32> -> vector<8x32xf32>
    %273 = arith.addf %246, %272 : vector<8x32xf32>
    %274 = vector.extract_strided_slice %208 {offsets = [0, 16], sizes = [8, 8], strides = [1, 1]} : vector<8x32xf32> to vector<8x8xf32>
    %275 = vector.extract_strided_slice %211 {offsets = [0, 16], sizes = [8, 8], strides = [1, 1]} : vector<8x32xf32> to vector<8x8xf32>
    %cst_89 = arith.constant dense<0.000000e+00> : vector<8x8xf32>
    %276 = tpu.matmul %274, %275, %cst_89 {dimension_numbers = #tpu.dot_dimension_numbers<[1], [1], [0], [0], [0, 0, 1, 0], [], []>} : vector<8x8xf32>, vector<8x8xf32>, vector<8x8xf32> -> vector<8x8xf32>
    %cst_90 = arith.constant 0.353553385 : f32
    %277 = vector.broadcast %cst_90 : f32 to vector<8x8xf32>
    %278 = arith.mulf %276, %277 : vector<8x8xf32>
    %cst_91 = arith.constant -1.000000e+30 : f32
    %279 = vector.broadcast %cst_91 : f32 to vector<8x8xf32>
    %280 = arith.select %217, %278, %279 : vector<8x8xi1>, vector<8x8xf32>
    %cst_92 = arith.constant dense<0xFF800000> : vector<8xf32>
    %281 = vector.multi_reduction <maximumf>, %280, %cst_92 [1] : vector<8x8xf32> to vector<8xf32>
    %282 = vector.shape_cast %281 : vector<8xf32> to vector<8x1xf32>
    %283 = vector.broadcast %282 : vector<8x1xf32> to vector<8x8xf32>
    %284 = arith.subf %280, %283 : vector<8x8xf32>
    %285 = math.exp %284 : vector<8x8xf32>
    %cst_93 = arith.constant dense<0.000000e+00> : vector<8xf32>
    %286 = vector.multi_reduction <add>, %285, %cst_93 [1] : vector<8x8xf32> to vector<8xf32>
    %287 = vector.shape_cast %286 : vector<8xf32> to vector<8x1xf32>
    %288 = vector.broadcast %287 : vector<8x1xf32> to vector<8x8xf32>
    %289 = arith.divf %285, %288 : vector<8x8xf32>
    %c16_i32_94 = arith.constant 16 : i32
    %290 = vector.broadcast %c16_i32_94 : i32 to vector<1x32xi32>
    %291 = arith.cmpi sge, %218, %290 : vector<1x32xi32>
    %c24_i32_95 = arith.constant 24 : i32
    %292 = vector.broadcast %c24_i32_95 : i32 to vector<1x32xi32>
    %293 = arith.cmpi slt, %218, %292 : vector<1x32xi32>
    %294 = arith.andi %291, %293 : vector<1x32xi1>
    %cst_96 = arith.constant 0.000000e+00 : f32
    %295 = vector.shape_cast %294 : vector<1x32xi1> to vector<1x32xi1>
    %296 = vector.broadcast %295 : vector<1x32xi1> to vector<8x32xi1>
    %297 = vector.broadcast %cst_96 : f32 to vector<8x32xf32>
    %298 = arith.select %296, %214, %297 : vector<8x32xi1>, vector<8x32xf32>
    %cst_97 = arith.constant dense<0.000000e+00> : vector<8x32xf32>
    %299 = tpu.matmul %289, %298, %cst_97 {dimension_numbers = #tpu.dot_dimension_numbers<[1], [0], [0], [1], [0, 0, 1, 1], [], []>} : vector<8x8xf32>, vector<8x32xf32>, vector<8x32xf32> -> vector<8x32xf32>
    %300 = arith.addf %273, %299 : vector<8x32xf32>
    %301 = vector.extract_strided_slice %208 {offsets = [0, 24], sizes = [8, 8], strides = [1, 1]} : vector<8x32xf32> to vector<8x8xf32>
    %302 = vector.extract_strided_slice %211 {offsets = [0, 24], sizes = [8, 8], strides = [1, 1]} : vector<8x32xf32> to vector<8x8xf32>
    %cst_98 = arith.constant dense<0.000000e+00> : vector<8x8xf32>
    %303 = tpu.matmul %301, %302, %cst_98 {dimension_numbers = #tpu.dot_dimension_numbers<[1], [1], [0], [0], [0, 0, 1, 0], [], []>} : vector<8x8xf32>, vector<8x8xf32>, vector<8x8xf32> -> vector<8x8xf32>
    %cst_99 = arith.constant 0.353553385 : f32
    %304 = vector.broadcast %cst_99 : f32 to vector<8x8xf32>
    %305 = arith.mulf %303, %304 : vector<8x8xf32>
    %cst_100 = arith.constant -1.000000e+30 : f32
    %306 = vector.broadcast %cst_100 : f32 to vector<8x8xf32>
    %307 = arith.select %217, %305, %306 : vector<8x8xi1>, vector<8x8xf32>
    %cst_101 = arith.constant dense<0xFF800000> : vector<8xf32>
    %308 = vector.multi_reduction <maximumf>, %307, %cst_101 [1] : vector<8x8xf32> to vector<8xf32>
    %309 = vector.shape_cast %308 : vector<8xf32> to vector<8x1xf32>
    %310 = vector.broadcast %309 : vector<8x1xf32> to vector<8x8xf32>
    %311 = arith.subf %307, %310 : vector<8x8xf32>
    %312 = math.exp %311 : vector<8x8xf32>
    %cst_102 = arith.constant dense<0.000000e+00> : vector<8xf32>
    %313 = vector.multi_reduction <add>, %312, %cst_102 [1] : vector<8x8xf32> to vector<8xf32>
    %314 = vector.shape_cast %313 : vector<8xf32> to vector<8x1xf32>
    %315 = vector.broadcast %314 : vector<8x1xf32> to vector<8x8xf32>
    %316 = arith.divf %312, %315 : vector<8x8xf32>
    %c24_i32_103 = arith.constant 24 : i32
    %317 = vector.broadcast %c24_i32_103 : i32 to vector<1x32xi32>
    %318 = arith.cmpi sge, %218, %317 : vector<1x32xi32>
    %c32_i32_104 = arith.constant 32 : i32
    %319 = vector.broadcast %c32_i32_104 : i32 to vector<1x32xi32>
    %320 = arith.cmpi slt, %218, %319 : vector<1x32xi32>
    %321 = arith.andi %318, %320 : vector<1x32xi1>
    %cst_105 = arith.constant 0.000000e+00 : f32
    %322 = vector.shape_cast %321 : vector<1x32xi1> to vector<1x32xi1>
    %323 = vector.broadcast %322 : vector<1x32xi1> to vector<8x32xi1>
    %324 = vector.broadcast %cst_105 : f32 to vector<8x32xf32>
    %325 = arith.select %323, %214, %324 : vector<8x32xi1>, vector<8x32xf32>
    %cst_106 = arith.constant dense<0.000000e+00> : vector<8x32xf32>
    %326 = tpu.matmul %316, %325, %cst_106 {dimension_numbers = #tpu.dot_dimension_numbers<[1], [0], [0], [1], [0, 0, 1, 1], [], []>} : vector<8x8xf32>, vector<8x32xf32>, vector<8x32xf32> -> vector<8x32xf32>
    %327 = arith.addf %300, %326 : vector<8x32xf32>
    %cst_107 = arith.constant dense<0.000000e+00> : vector<8x32xf32>
    %328 = tpu.matmul %327, %203, %cst_107 {dimension_numbers = #tpu.dot_dimension_numbers<[1], [0], [0], [1], [0, 0, 1, 1], [], []>} : vector<8x32xf32>, vector<32x32xf32>, vector<8x32xf32> -> vector<8x32xf32>
    %329 = vector.broadcast %204 : vector<1x32xf32> to vector<8x32xf32>
    %330 = arith.addf %328, %329 : vector<8x32xf32>
    %331 = arith.addf %198, %330 : vector<8x32xf32>
    %332 = vector.extract_strided_slice %1 {offsets = [5, 0], sizes = [1, 32], strides = [1, 1]} : vector<18x128xf32> to vector<1x32xf32>
    %333 = vector.extract_strided_slice %1 {offsets = [6, 0], sizes = [1, 32], strides = [1, 1]} : vector<18x128xf32> to vector<1x32xf32>
    %cst_108 = arith.constant dense<0.000000e+00> : vector<8xf32>
    %334 = vector.multi_reduction <add>, %331, %cst_108 [1] : vector<8x32xf32> to vector<8xf32>
    %335 = vector.shape_cast %334 : vector<8xf32> to vector<8x1xf32>
    %cst_109 = arith.constant 3.200000e+01 : f32
    %336 = vector.broadcast %cst_109 : f32 to vector<8x1xf32>
    %337 = arith.divf %335, %336 : vector<8x1xf32>
    %338 = vector.broadcast %337 : vector<8x1xf32> to vector<8x32xf32>
    %339 = arith.subf %331, %338 : vector<8x32xf32>
    %340 = arith.mulf %339, %339 : vector<8x32xf32>
    %cst_110 = arith.constant dense<0.000000e+00> : vector<8xf32>
    %341 = vector.multi_reduction <add>, %340, %cst_110 [1] : vector<8x32xf32> to vector<8xf32>
    %342 = vector.shape_cast %341 : vector<8xf32> to vector<8x1xf32>
    %cst_111 = arith.constant 3.200000e+01 : f32
    %343 = vector.broadcast %cst_111 : f32 to vector<8x1xf32>
    %344 = arith.divf %342, %343 : vector<8x1xf32>
    %345 = vector.broadcast %337 : vector<8x1xf32> to vector<8x32xf32>
    %346 = arith.subf %331, %345 : vector<8x32xf32>
    %cst_112 = arith.constant 9.99999974E-6 : f32
    %347 = vector.broadcast %cst_112 : f32 to vector<8x1xf32>
    %348 = arith.addf %344, %347 : vector<8x1xf32>
    %349 = math.rsqrt %348 : vector<8x1xf32>
    %350 = vector.broadcast %349 : vector<8x1xf32> to vector<8x32xf32>
    %351 = arith.mulf %346, %350 : vector<8x32xf32>
    %352 = vector.broadcast %332 : vector<1x32xf32> to vector<8x32xf32>
    %353 = arith.mulf %351, %352 : vector<8x32xf32>
    %354 = vector.broadcast %333 : vector<1x32xf32> to vector<8x32xf32>
    %355 = arith.addf %353, %354 : vector<8x32xf32>
    %c0_113 = arith.constant 0 : index
    %c0_114 = arith.constant 0 : index
    %356 = vector.load %arg12[%c0_113, %c0_114] : memref<32x32xf32, #tpu.memory_space<vmem>>, vector<32x32xf32>
    %357 = vector.extract_strided_slice %1 {offsets = [7, 0], sizes = [1, 32], strides = [1, 1]} : vector<18x128xf32> to vector<1x32xf32>
    %c0_115 = arith.constant 0 : index
    %c0_116 = arith.constant 0 : index
    %358 = vector.load %arg13[%c0_115, %c0_116] : memref<32x64xf32, #tpu.memory_space<vmem>>, vector<32x64xf32>
    %359 = vector.extract_strided_slice %1 {offsets = [8, 0], sizes = [1, 32], strides = [1, 1]} : vector<18x128xf32> to vector<1x32xf32>
    %360 = vector.extract_strided_slice %1 {offsets = [9, 0], sizes = [1, 32], strides = [1, 1]} : vector<18x128xf32> to vector<1x32xf32>
    %c0_117 = arith.constant 0 : index
    %c0_118 = arith.constant 0 : index
    %361 = vector.load %arg14[%c0_117, %c0_118] : memref<32x32xf32, #tpu.memory_space<vmem>>, vector<32x32xf32>
    %362 = vector.extract_strided_slice %1 {offsets = [10, 0], sizes = [1, 32], strides = [1, 1]} : vector<18x128xf32> to vector<1x32xf32>
    %cst_119 = arith.constant dense<0.000000e+00> : vector<8x32xf32>
    %363 = tpu.matmul %355, %356, %cst_119 {dimension_numbers = #tpu.dot_dimension_numbers<[1], [0], [0], [1], [0, 0, 1, 1], [], []>} : vector<8x32xf32>, vector<32x32xf32>, vector<8x32xf32> -> vector<8x32xf32>
    %364 = vector.broadcast %357 : vector<1x32xf32> to vector<8x32xf32>
    %365 = arith.addf %363, %364 : vector<8x32xf32>
    %cst_120 = arith.constant dense<0.000000e+00> : vector<8x64xf32>
    %366 = tpu.matmul %191, %358, %cst_120 {dimension_numbers = #tpu.dot_dimension_numbers<[1], [0], [0], [1], [0, 0, 1, 1], [], []>} : vector<8x32xf32>, vector<32x64xf32>, vector<8x64xf32> -> vector<8x64xf32>
    %367 = vector.extract_strided_slice %366 {offsets = [0, 0], sizes = [8, 32], strides = [1, 1]} : vector<8x64xf32> to vector<8x32xf32>
    %368 = vector.broadcast %359 : vector<1x32xf32> to vector<8x32xf32>
    %369 = arith.addf %367, %368 : vector<8x32xf32>
    %370 = vector.extract_strided_slice %366 {offsets = [0, 32], sizes = [8, 32], strides = [1, 1]} : vector<8x64xf32> to vector<8x32xf32>
    %371 = vector.broadcast %360 : vector<1x32xf32> to vector<8x32xf32>
    %372 = arith.addf %370, %371 : vector<8x32xf32>
    %373 = tpu.iota {dimensions = array<i32: 1>} : vector<1x32xi32>
    %cst_121 = arith.constant 0.000000e+00 : f32
    %374 = vector.broadcast %cst_121 : f32 to vector<8x32xf32>
    %375 = vector.extract_strided_slice %365 {offsets = [0, 0], sizes = [8, 8], strides = [1, 1]} : vector<8x32xf32> to vector<8x8xf32>
    %376 = vector.extract_strided_slice %369 {offsets = [0, 0], sizes = [8, 8], strides = [1, 1]} : vector<8x32xf32> to vector<8x8xf32>
    %cst_122 = arith.constant dense<0.000000e+00> : vector<8x8xf32>
    %377 = tpu.matmul %375, %376, %cst_122 {dimension_numbers = #tpu.dot_dimension_numbers<[1], [1], [0], [0], [0, 0, 1, 0], [], []>} : vector<8x8xf32>, vector<8x8xf32>, vector<8x8xf32> -> vector<8x8xf32>
    %cst_123 = arith.constant 0.353553385 : f32
    %378 = vector.broadcast %cst_123 : f32 to vector<8x8xf32>
    %379 = arith.mulf %377, %378 : vector<8x8xf32>
    %cst_124 = arith.constant dense<0xFF800000> : vector<8xf32>
    %380 = vector.multi_reduction <maximumf>, %379, %cst_124 [1] : vector<8x8xf32> to vector<8xf32>
    %381 = vector.shape_cast %380 : vector<8xf32> to vector<8x1xf32>
    %382 = vector.broadcast %381 : vector<8x1xf32> to vector<8x8xf32>
    %383 = arith.subf %379, %382 : vector<8x8xf32>
    %384 = math.exp %383 : vector<8x8xf32>
    %cst_125 = arith.constant dense<0.000000e+00> : vector<8xf32>
    %385 = vector.multi_reduction <add>, %384, %cst_125 [1] : vector<8x8xf32> to vector<8xf32>
    %386 = vector.shape_cast %385 : vector<8xf32> to vector<8x1xf32>
    %387 = vector.broadcast %386 : vector<8x1xf32> to vector<8x8xf32>
    %388 = arith.divf %384, %387 : vector<8x8xf32>
    %c0_i32_126 = arith.constant 0 : i32
    %389 = vector.broadcast %c0_i32_126 : i32 to vector<1x32xi32>
    %390 = arith.cmpi sge, %373, %389 : vector<1x32xi32>
    %c8_i32_127 = arith.constant 8 : i32
    %391 = vector.broadcast %c8_i32_127 : i32 to vector<1x32xi32>
    %392 = arith.cmpi slt, %373, %391 : vector<1x32xi32>
    %393 = arith.andi %390, %392 : vector<1x32xi1>
    %cst_128 = arith.constant 0.000000e+00 : f32
    %394 = vector.shape_cast %393 : vector<1x32xi1> to vector<1x32xi1>
    %395 = vector.broadcast %394 : vector<1x32xi1> to vector<8x32xi1>
    %396 = vector.broadcast %cst_128 : f32 to vector<8x32xf32>
    %397 = arith.select %395, %372, %396 : vector<8x32xi1>, vector<8x32xf32>
    %cst_129 = arith.constant dense<0.000000e+00> : vector<8x32xf32>
    %398 = tpu.matmul %388, %397, %cst_129 {dimension_numbers = #tpu.dot_dimension_numbers<[1], [0], [0], [1], [0, 0, 1, 1], [], []>} : vector<8x8xf32>, vector<8x32xf32>, vector<8x32xf32> -> vector<8x32xf32>
    %399 = arith.addf %374, %398 : vector<8x32xf32>
    %400 = vector.extract_strided_slice %365 {offsets = [0, 8], sizes = [8, 8], strides = [1, 1]} : vector<8x32xf32> to vector<8x8xf32>
    %401 = vector.extract_strided_slice %369 {offsets = [0, 8], sizes = [8, 8], strides = [1, 1]} : vector<8x32xf32> to vector<8x8xf32>
    %cst_130 = arith.constant dense<0.000000e+00> : vector<8x8xf32>
    %402 = tpu.matmul %400, %401, %cst_130 {dimension_numbers = #tpu.dot_dimension_numbers<[1], [1], [0], [0], [0, 0, 1, 0], [], []>} : vector<8x8xf32>, vector<8x8xf32>, vector<8x8xf32> -> vector<8x8xf32>
    %cst_131 = arith.constant 0.353553385 : f32
    %403 = vector.broadcast %cst_131 : f32 to vector<8x8xf32>
    %404 = arith.mulf %402, %403 : vector<8x8xf32>
    %cst_132 = arith.constant dense<0xFF800000> : vector<8xf32>
    %405 = vector.multi_reduction <maximumf>, %404, %cst_132 [1] : vector<8x8xf32> to vector<8xf32>
    %406 = vector.shape_cast %405 : vector<8xf32> to vector<8x1xf32>
    %407 = vector.broadcast %406 : vector<8x1xf32> to vector<8x8xf32>
    %408 = arith.subf %404, %407 : vector<8x8xf32>
    %409 = math.exp %408 : vector<8x8xf32>
    %cst_133 = arith.constant dense<0.000000e+00> : vector<8xf32>
    %410 = vector.multi_reduction <add>, %409, %cst_133 [1] : vector<8x8xf32> to vector<8xf32>
    %411 = vector.shape_cast %410 : vector<8xf32> to vector<8x1xf32>
    %412 = vector.broadcast %411 : vector<8x1xf32> to vector<8x8xf32>
    %413 = arith.divf %409, %412 : vector<8x8xf32>
    %c8_i32_134 = arith.constant 8 : i32
    %414 = vector.broadcast %c8_i32_134 : i32 to vector<1x32xi32>
    %415 = arith.cmpi sge, %373, %414 : vector<1x32xi32>
    %c16_i32_135 = arith.constant 16 : i32
    %416 = vector.broadcast %c16_i32_135 : i32 to vector<1x32xi32>
    %417 = arith.cmpi slt, %373, %416 : vector<1x32xi32>
    %418 = arith.andi %415, %417 : vector<1x32xi1>
    %cst_136 = arith.constant 0.000000e+00 : f32
    %419 = vector.shape_cast %418 : vector<1x32xi1> to vector<1x32xi1>
    %420 = vector.broadcast %419 : vector<1x32xi1> to vector<8x32xi1>
    %421 = vector.broadcast %cst_136 : f32 to vector<8x32xf32>
    %422 = arith.select %420, %372, %421 : vector<8x32xi1>, vector<8x32xf32>
    %cst_137 = arith.constant dense<0.000000e+00> : vector<8x32xf32>
    %423 = tpu.matmul %413, %422, %cst_137 {dimension_numbers = #tpu.dot_dimension_numbers<[1], [0], [0], [1], [0, 0, 1, 1], [], []>} : vector<8x8xf32>, vector<8x32xf32>, vector<8x32xf32> -> vector<8x32xf32>
    %424 = arith.addf %399, %423 : vector<8x32xf32>
    %425 = vector.extract_strided_slice %365 {offsets = [0, 16], sizes = [8, 8], strides = [1, 1]} : vector<8x32xf32> to vector<8x8xf32>
    %426 = vector.extract_strided_slice %369 {offsets = [0, 16], sizes = [8, 8], strides = [1, 1]} : vector<8x32xf32> to vector<8x8xf32>
    %cst_138 = arith.constant dense<0.000000e+00> : vector<8x8xf32>
    %427 = tpu.matmul %425, %426, %cst_138 {dimension_numbers = #tpu.dot_dimension_numbers<[1], [1], [0], [0], [0, 0, 1, 0], [], []>} : vector<8x8xf32>, vector<8x8xf32>, vector<8x8xf32> -> vector<8x8xf32>
    %cst_139 = arith.constant 0.353553385 : f32
    %428 = vector.broadcast %cst_139 : f32 to vector<8x8xf32>
    %429 = arith.mulf %427, %428 : vector<8x8xf32>
    %cst_140 = arith.constant dense<0xFF800000> : vector<8xf32>
    %430 = vector.multi_reduction <maximumf>, %429, %cst_140 [1] : vector<8x8xf32> to vector<8xf32>
    %431 = vector.shape_cast %430 : vector<8xf32> to vector<8x1xf32>
    %432 = vector.broadcast %431 : vector<8x1xf32> to vector<8x8xf32>
    %433 = arith.subf %429, %432 : vector<8x8xf32>
    %434 = math.exp %433 : vector<8x8xf32>
    %cst_141 = arith.constant dense<0.000000e+00> : vector<8xf32>
    %435 = vector.multi_reduction <add>, %434, %cst_141 [1] : vector<8x8xf32> to vector<8xf32>
    %436 = vector.shape_cast %435 : vector<8xf32> to vector<8x1xf32>
    %437 = vector.broadcast %436 : vector<8x1xf32> to vector<8x8xf32>
    %438 = arith.divf %434, %437 : vector<8x8xf32>
    %c16_i32_142 = arith.constant 16 : i32
    %439 = vector.broadcast %c16_i32_142 : i32 to vector<1x32xi32>
    %440 = arith.cmpi sge, %373, %439 : vector<1x32xi32>
    %c24_i32_143 = arith.constant 24 : i32
    %441 = vector.broadcast %c24_i32_143 : i32 to vector<1x32xi32>
    %442 = arith.cmpi slt, %373, %441 : vector<1x32xi32>
    %443 = arith.andi %440, %442 : vector<1x32xi1>
    %cst_144 = arith.constant 0.000000e+00 : f32
    %444 = vector.shape_cast %443 : vector<1x32xi1> to vector<1x32xi1>
    %445 = vector.broadcast %444 : vector<1x32xi1> to vector<8x32xi1>
    %446 = vector.broadcast %cst_144 : f32 to vector<8x32xf32>
    %447 = arith.select %445, %372, %446 : vector<8x32xi1>, vector<8x32xf32>
    %cst_145 = arith.constant dense<0.000000e+00> : vector<8x32xf32>
    %448 = tpu.matmul %438, %447, %cst_145 {dimension_numbers = #tpu.dot_dimension_numbers<[1], [0], [0], [1], [0, 0, 1, 1], [], []>} : vector<8x8xf32>, vector<8x32xf32>, vector<8x32xf32> -> vector<8x32xf32>
    %449 = arith.addf %424, %448 : vector<8x32xf32>
    %450 = vector.extract_strided_slice %365 {offsets = [0, 24], sizes = [8, 8], strides = [1, 1]} : vector<8x32xf32> to vector<8x8xf32>
    %451 = vector.extract_strided_slice %369 {offsets = [0, 24], sizes = [8, 8], strides = [1, 1]} : vector<8x32xf32> to vector<8x8xf32>
    %cst_146 = arith.constant dense<0.000000e+00> : vector<8x8xf32>
    %452 = tpu.matmul %450, %451, %cst_146 {dimension_numbers = #tpu.dot_dimension_numbers<[1], [1], [0], [0], [0, 0, 1, 0], [], []>} : vector<8x8xf32>, vector<8x8xf32>, vector<8x8xf32> -> vector<8x8xf32>
    %cst_147 = arith.constant 0.353553385 : f32
    %453 = vector.broadcast %cst_147 : f32 to vector<8x8xf32>
    %454 = arith.mulf %452, %453 : vector<8x8xf32>
    %cst_148 = arith.constant dense<0xFF800000> : vector<8xf32>
    %455 = vector.multi_reduction <maximumf>, %454, %cst_148 [1] : vector<8x8xf32> to vector<8xf32>
    %456 = vector.shape_cast %455 : vector<8xf32> to vector<8x1xf32>
    %457 = vector.broadcast %456 : vector<8x1xf32> to vector<8x8xf32>
    %458 = arith.subf %454, %457 : vector<8x8xf32>
    %459 = math.exp %458 : vector<8x8xf32>
    %cst_149 = arith.constant dense<0.000000e+00> : vector<8xf32>
    %460 = vector.multi_reduction <add>, %459, %cst_149 [1] : vector<8x8xf32> to vector<8xf32>
    %461 = vector.shape_cast %460 : vector<8xf32> to vector<8x1xf32>
    %462 = vector.broadcast %461 : vector<8x1xf32> to vector<8x8xf32>
    %463 = arith.divf %459, %462 : vector<8x8xf32>
    %c24_i32_150 = arith.constant 24 : i32
    %464 = vector.broadcast %c24_i32_150 : i32 to vector<1x32xi32>
    %465 = arith.cmpi sge, %373, %464 : vector<1x32xi32>
    %c32_i32_151 = arith.constant 32 : i32
    %466 = vector.broadcast %c32_i32_151 : i32 to vector<1x32xi32>
    %467 = arith.cmpi slt, %373, %466 : vector<1x32xi32>
    %468 = arith.andi %465, %467 : vector<1x32xi1>
    %cst_152 = arith.constant 0.000000e+00 : f32
    %469 = vector.shape_cast %468 : vector<1x32xi1> to vector<1x32xi1>
    %470 = vector.broadcast %469 : vector<1x32xi1> to vector<8x32xi1>
    %471 = vector.broadcast %cst_152 : f32 to vector<8x32xf32>
    %472 = arith.select %470, %372, %471 : vector<8x32xi1>, vector<8x32xf32>
    %cst_153 = arith.constant dense<0.000000e+00> : vector<8x32xf32>
    %473 = tpu.matmul %463, %472, %cst_153 {dimension_numbers = #tpu.dot_dimension_numbers<[1], [0], [0], [1], [0, 0, 1, 1], [], []>} : vector<8x8xf32>, vector<8x32xf32>, vector<8x32xf32> -> vector<8x32xf32>
    %474 = arith.addf %449, %473 : vector<8x32xf32>
    %cst_154 = arith.constant dense<0.000000e+00> : vector<8x32xf32>
    %475 = tpu.matmul %474, %361, %cst_154 {dimension_numbers = #tpu.dot_dimension_numbers<[1], [0], [0], [1], [0, 0, 1, 1], [], []>} : vector<8x32xf32>, vector<32x32xf32>, vector<8x32xf32> -> vector<8x32xf32>
    %476 = vector.broadcast %362 : vector<1x32xf32> to vector<8x32xf32>
    %477 = arith.addf %475, %476 : vector<8x32xf32>
    %478 = arith.addf %355, %477 : vector<8x32xf32>
    %479 = vector.extract_strided_slice %1 {offsets = [11, 0], sizes = [1, 32], strides = [1, 1]} : vector<18x128xf32> to vector<1x32xf32>
    %480 = vector.extract_strided_slice %1 {offsets = [12, 0], sizes = [1, 32], strides = [1, 1]} : vector<18x128xf32> to vector<1x32xf32>
    %cst_155 = arith.constant dense<0.000000e+00> : vector<8xf32>
    %481 = vector.multi_reduction <add>, %478, %cst_155 [1] : vector<8x32xf32> to vector<8xf32>
    %482 = vector.shape_cast %481 : vector<8xf32> to vector<8x1xf32>
    %cst_156 = arith.constant 3.200000e+01 : f32
    %483 = vector.broadcast %cst_156 : f32 to vector<8x1xf32>
    %484 = arith.divf %482, %483 : vector<8x1xf32>
    %485 = vector.broadcast %484 : vector<8x1xf32> to vector<8x32xf32>
    %486 = arith.subf %478, %485 : vector<8x32xf32>
    %487 = arith.mulf %486, %486 : vector<8x32xf32>
    %cst_157 = arith.constant dense<0.000000e+00> : vector<8xf32>
    %488 = vector.multi_reduction <add>, %487, %cst_157 [1] : vector<8x32xf32> to vector<8xf32>
    %489 = vector.shape_cast %488 : vector<8xf32> to vector<8x1xf32>
    %cst_158 = arith.constant 3.200000e+01 : f32
    %490 = vector.broadcast %cst_158 : f32 to vector<8x1xf32>
    %491 = arith.divf %489, %490 : vector<8x1xf32>
    %492 = vector.broadcast %484 : vector<8x1xf32> to vector<8x32xf32>
    %493 = arith.subf %478, %492 : vector<8x32xf32>
    %cst_159 = arith.constant 9.99999974E-6 : f32
    %494 = vector.broadcast %cst_159 : f32 to vector<8x1xf32>
    %495 = arith.addf %491, %494 : vector<8x1xf32>
    %496 = math.rsqrt %495 : vector<8x1xf32>
    %497 = vector.broadcast %496 : vector<8x1xf32> to vector<8x32xf32>
    %498 = arith.mulf %493, %497 : vector<8x32xf32>
    %499 = vector.broadcast %479 : vector<1x32xf32> to vector<8x32xf32>
    %500 = arith.mulf %498, %499 : vector<8x32xf32>
    %501 = vector.broadcast %480 : vector<1x32xf32> to vector<8x32xf32>
    %502 = arith.addf %500, %501 : vector<8x32xf32>
    %c0_160 = arith.constant 0 : index
    %c0_161 = arith.constant 0 : index
    %503 = vector.load %arg15[%c0_160, %c0_161] : memref<32x64xf32, #tpu.memory_space<vmem>>, vector<32x64xf32>
    %504 = vector.extract_strided_slice %1 {offsets = [13, 0], sizes = [1, 64], strides = [1, 1]} : vector<18x128xf32> to vector<1x64xf32>
    %c0_162 = arith.constant 0 : index
    %c0_163 = arith.constant 0 : index
    %505 = vector.load %arg16[%c0_162, %c0_163] : memref<64x32xf32, #tpu.memory_space<vmem>>, vector<64x32xf32>
    %506 = vector.extract_strided_slice %1 {offsets = [14, 0], sizes = [1, 32], strides = [1, 1]} : vector<18x128xf32> to vector<1x32xf32>
    %cst_164 = arith.constant dense<0.000000e+00> : vector<8x64xf32>
    %507 = tpu.matmul %502, %503, %cst_164 {dimension_numbers = #tpu.dot_dimension_numbers<[1], [0], [0], [1], [0, 0, 1, 1], [], []>} : vector<8x32xf32>, vector<32x64xf32>, vector<8x64xf32> -> vector<8x64xf32>
    %508 = vector.broadcast %504 : vector<1x64xf32> to vector<8x64xf32>
    %509 = arith.addf %507, %508 : vector<8x64xf32>
    %cst_165 = arith.constant 0.000000e+00 : f32
    %510 = vector.broadcast %cst_165 : f32 to vector<8x64xf32>
    %511 = arith.maximumf %509, %510 : vector<8x64xf32>
    %cst_166 = arith.constant dense<0.000000e+00> : vector<8x32xf32>
    %512 = tpu.matmul %511, %505, %cst_166 {dimension_numbers = #tpu.dot_dimension_numbers<[1], [0], [0], [1], [0, 0, 1, 1], [], []>} : vector<8x64xf32>, vector<64x32xf32>, vector<8x32xf32> -> vector<8x32xf32>
    %513 = vector.broadcast %506 : vector<1x32xf32> to vector<8x32xf32>
    %514 = arith.addf %512, %513 : vector<8x32xf32>
    %515 = arith.addf %502, %514 : vector<8x32xf32>
    %516 = vector.extract_strided_slice %1 {offsets = [15, 0], sizes = [1, 32], strides = [1, 1]} : vector<18x128xf32> to vector<1x32xf32>
    %517 = vector.extract_strided_slice %1 {offsets = [16, 0], sizes = [1, 32], strides = [1, 1]} : vector<18x128xf32> to vector<1x32xf32>
    %cst_167 = arith.constant dense<0.000000e+00> : vector<8xf32>
    %518 = vector.multi_reduction <add>, %515, %cst_167 [1] : vector<8x32xf32> to vector<8xf32>
    %519 = vector.shape_cast %518 : vector<8xf32> to vector<8x1xf32>
    %cst_168 = arith.constant 3.200000e+01 : f32
    %520 = vector.broadcast %cst_168 : f32 to vector<8x1xf32>
    %521 = arith.divf %519, %520 : vector<8x1xf32>
    %522 = vector.broadcast %521 : vector<8x1xf32> to vector<8x32xf32>
    %523 = arith.subf %515, %522 : vector<8x32xf32>
    %524 = arith.mulf %523, %523 : vector<8x32xf32>
    %cst_169 = arith.constant dense<0.000000e+00> : vector<8xf32>
    %525 = vector.multi_reduction <add>, %524, %cst_169 [1] : vector<8x32xf32> to vector<8xf32>
    %526 = vector.shape_cast %525 : vector<8xf32> to vector<8x1xf32>
    %cst_170 = arith.constant 3.200000e+01 : f32
    %527 = vector.broadcast %cst_170 : f32 to vector<8x1xf32>
    %528 = arith.divf %526, %527 : vector<8x1xf32>
    %529 = vector.broadcast %521 : vector<8x1xf32> to vector<8x32xf32>
    %530 = arith.subf %515, %529 : vector<8x32xf32>
    %cst_171 = arith.constant 9.99999974E-6 : f32
    %531 = vector.broadcast %cst_171 : f32 to vector<8x1xf32>
    %532 = arith.addf %528, %531 : vector<8x1xf32>
    %533 = math.rsqrt %532 : vector<8x1xf32>
    %534 = vector.broadcast %533 : vector<8x1xf32> to vector<8x32xf32>
    %535 = arith.mulf %530, %534 : vector<8x32xf32>
    %536 = vector.broadcast %516 : vector<1x32xf32> to vector<8x32xf32>
    %537 = arith.mulf %535, %536 : vector<8x32xf32>
    %538 = vector.broadcast %517 : vector<1x32xf32> to vector<8x32xf32>
    %539 = arith.addf %537, %538 : vector<8x32xf32>
    %c0_172 = arith.constant 0 : index
    %c0_173 = arith.constant 0 : index
    %540 = vector.load %arg17[%c0_172, %c0_173] : memref<32x128xf32, #tpu.memory_space<vmem>>, vector<32x128xf32>
    %cst_174 = arith.constant dense<0.000000e+00> : vector<8x128xf32>
    %541 = tpu.matmul %539, %540, %cst_174 {dimension_numbers = #tpu.dot_dimension_numbers<[1], [0], [0], [1], [0, 0, 1, 1], [], []>} : vector<8x32xf32>, vector<32x128xf32>, vector<8x128xf32> -> vector<8x128xf32>
    %542 = vector.extract_strided_slice %1 {offsets = [17, 0], sizes = [1, 128], strides = [1, 1]} : vector<18x128xf32> to vector<1x128xf32>
    %543 = vector.broadcast %542 : vector<1x128xf32> to vector<8x128xf32>
    %544 = arith.addf %541, %543 : vector<8x128xf32>
    %c0_175 = arith.constant 0 : index
    %c0_176 = arith.constant 0 : index
    %c0_177 = arith.constant 0 : index
    %545 = vector.load %arg19[%c0_175, %c0_176, %c0_177] : memref<1x8x128xf32, #tpu.memory_space<vmem>>, vector<1x8x128xf32>
    %546 = vector.shape_cast %545 : vector<1x8x128xf32> to vector<8x128xf32>
    %547 = vector.shape_cast %544 : vector<8x128xf32> to vector<1x8x128xf32>
    tpu.vector_store %arg19[%c0_175, %c0_176, %c0_177], %547 {strides = array<i32>} : memref<1x8x128xf32, #tpu.memory_space<vmem>>, vector<1x8x128xf32>,
    return
  }
  func.func @transform_0(%arg0: i32) -> (i32, i32, i32) {
    %c0_i32 = arith.constant 0 : i32
    %c0_i32_0 = arith.constant 0 : i32
    %c0_i32_1 = arith.constant 0 : i32
    return %arg0, %c0_i32, %c0_i32_0 : i32, i32, i32
  }
  func.func @transform_1(%arg0: i32) -> (i32, i32, i32) {
    %c0_i32 = arith.constant 0 : i32
    %c0_i32_0 = arith.constant 0 : i32
    %c0_i32_1 = arith.constant 0 : i32
    return %arg0, %c0_i32, %c0_i32_0 : i32, i32, i32
  }
  func.func @transform_2(%arg0: i32) -> (i32, i32) {
    %c0_i32 = arith.constant 0 : i32
    %c0_i32_0 = arith.constant 0 : i32
    %c0_i32_1 = arith.constant 0 : i32
    return %c0_i32, %c0_i32_0 : i32, i32
  }
  func.func @transform_3(%arg0: i32) -> (i32, i32) {
    %c0_i32 = arith.constant 0 : i32
    %c0_i32_0 = arith.constant 0 : i32
    %c0_i32_1 = arith.constant 0 : i32
    return %c0_i32, %c0_i32_0 : i32, i32
  }
  func.func @transform_4(%arg0: i32) -> (i32, i32) {
    %c0_i32 = arith.constant 0 : i32
    %c0_i32_0 = arith.constant 0 : i32
    %c0_i32_1 = arith.constant 0 : i32
    return %c0_i32, %c0_i32_0 : i32, i32
  }
  func.func @transform_5(%arg0: i32) -> (i32, i32) {
    %c0_i32 = arith.constant 0 : i32
    %c0_i32_0 = arith.constant 0 : i32
    %c0_i32_1 = arith.constant 0 : i32
    return %c0_i32, %c0_i32_0 : i32, i32
  }
  func.func @transform_6(%arg0: i32) -> (i32, i32) {
    %c0_i32 = arith.constant 0 : i32
    %c0_i32_0 = arith.constant 0 : i32
    %c0_i32_1 = arith.constant 0 : i32
    return %c0_i32, %c0_i32_0 : i32, i32
  }
  func.func @transform_7(%arg0: i32) -> (i32, i32) {
    %c0_i32 = arith.constant 0 : i32
    %c0_i32_0 = arith.constant 0 : i32
    %c0_i32_1 = arith.constant 0 : i32
    return %c0_i32, %c0_i32_0 : i32, i32
  }
  func.func @transform_8(%arg0: i32) -> (i32, i32) {
    %c0_i32 = arith.constant 0 : i32
    %c0_i32_0 = arith.constant 0 : i32
    %c0_i32_1 = arith.constant 0 : i32
    return %c0_i32, %c0_i32_0 : i32, i32
  }
  func.func @transform_9(%arg0: i32) -> (i32, i32) {
    %c0_i32 = arith.constant 0 : i32
    %c0_i32_0 = arith.constant 0 : i32
    %c0_i32_1 = arith.constant 0 : i32
    return %c0_i32, %c0_i32_0 : i32, i32
  }
  func.func @transform_10(%arg0: i32) -> (i32, i32) {
    %c0_i32 = arith.constant 0 : i32
    %c0_i32_0 = arith.constant 0 : i32
    %c0_i32_1 = arith.constant 0 : i32
    return %c0_i32, %c0_i32_0 : i32, i32
  }
  func.func @transform_11(%arg0: i32) -> (i32, i32) {
    %c0_i32 = arith.constant 0 : i32
    %c0_i32_0 = arith.constant 0 : i32
    %c0_i32_1 = arith.constant 0 : i32
    return %c0_i32, %c0_i32_0 : i32, i32
  }
  func.func @transform_12(%arg0: i32) -> (i32, i32) {
    %c0_i32 = arith.constant 0 : i32
    %c0_i32_0 = arith.constant 0 : i32
    %c0_i32_1 = arith.constant 0 : i32
    return %c0_i32, %c0_i32_0 : i32, i32
  }
  func.func @transform_13(%arg0: i32) -> (i32, i32) {
    %c0_i32 = arith.constant 0 : i32
    %c0_i32_0 = arith.constant 0 : i32
    %c0_i32_1 = arith.constant 0 : i32
    return %c0_i32, %c0_i32_0 : i32, i32
  }
  func.func @transform_14(%arg0: i32) -> (i32, i32) {
    %c0_i32 = arith.constant 0 : i32
    %c0_i32_0 = arith.constant 0 : i32
    %c0_i32_1 = arith.constant 0 : i32
    return %c0_i32, %c0_i32_0 : i32, i32
  }
  func.func @transform_15(%arg0: i32) -> (i32, i32) {
    %c0_i32 = arith.constant 0 : i32
    %c0_i32_0 = arith.constant 0 : i32
    %c0_i32_1 = arith.constant 0 : i32
    return %c0_i32, %c0_i32_0 : i32, i32
  }
  func.func @transform_16(%arg0: i32) -> (i32, i32) {
    %c0_i32 = arith.constant 0 : i32
    %c0_i32_0 = arith.constant 0 : i32
    %c0_i32_1 = arith.constant 0 : i32
    return %c0_i32, %c0_i32_0 : i32, i32
  }
  func.func @transform_17(%arg0: i32) -> (i32, i32) {
    %c0_i32 = arith.constant 0 : i32
    %c0_i32_0 = arith.constant 0 : i32
    %c0_i32_1 = arith.constant 0 : i32
    return %c0_i32, %c0_i32_0 : i32, i32
  }
  func.func @transform_18(%arg0: i32) -> (i32, i32, i32) {
    %c0_i32 = arith.constant 0 : i32
    %c0_i32_0 = arith.constant 0 : i32
    %c0_i32_1 = arith.constant 0 : i32
    return %arg0, %c0_i32, %c0_i32_0 : i32, i32, i32
  }
}

</mosaic_0001>

<bundles_post_ra>
// kernel: transformer_forward.1
= control target key start
LH: loop header
LB: loop body
LE: loop exit
PB: predicated region body
PF: predicated region fallthrough
CT: control target
= control target key end

     0   :  { %s3563_s0 = inlined_call_operand.vmem [shape: f32[2,8,4], index: 0, kind: input, shape index: {}]   ;;  %s3564_s1 = inlined_call_operand.vmem [shape: f32[2,8,4], index: 1, kind: input, shape index: {}]   ;;  %s3565_s2 = inlined_call_operand.hbm [shape: f32[4,32], index: 2, kind: input, shape index: {}]   ;;  %s3566_s3 = inlined_call_operand.vmem [shape: f32[32,96], index: 3, kind: input, shape index: {}]   ;;  %s3567_s4 = inlined_call_operand.vmem [shape: f32[32,32], index: 4, kind: input, shape index: {}]   ;;  %s3568_s5 = inlined_call_operand.vmem [shape: f32[32,64], index: 5, kind: input, shape index: {}]   ;;  %s3569_s6 = inlined_call_operand.vmem [shape: f32[64,32], index: 6, kind: input, shape index: {}]   ;;  %s3570_s7 = inlined_call_operand.vmem [shape: f32[11,128], index: 7, kind: input, shape index: {}]   ;;  %s3571_s8 = inlined_call_operand.hbm [shape: f32[4,32], index: 8, kind: input, shape index: {}]   ;;  %s3572_s9 = inlined_call_operand.vmem [shape: f32[32,96], index: 9, kind: input, shape index: {}]   ;;  %s3573_s10 = inlined_call_operand.vmem [shape: f32[32,32], index: 10, kind: input, shape index: {}]   ;;  %s3574_s11 = inlined_call_operand.hbm [shape: f32[32,32], index: 11, kind: input, shape index: {}]   ;;  %s3575_s12 = inlined_call_operand.hbm [shape: f32[32,64], index: 12, kind: input, shape index: {}]   ;;  %s3576_s13 = inlined_call_operand.hbm [shape: f32[32,32], index: 13, kind: input, shape index: {}]   ;;  %s3577_s14 = inlined_call_operand.hbm [shape: f32[32,64], index: 14, kind: input, shape index: {}]   ;;  %s3578_s15 = inlined_call_operand.vmem [shape: f32[64,32], index: 15, kind: input, shape index: {}]   ;;  %s3579_s16 = inlined_call_operand.hbm [shape: f32[32,128], index: 16, kind: input, shape index: {}]   ;;  %s3580_s17 = inlined_call_operand.hbm [shape: f32[18,128], index: 17, kind: input, shape index: {}]   ;;  %s3581_s18 = inlined_call_operand.vmem [shape: f32[2,8,128], index: 18, kind: output, shape index: {}]  }
   0x1   :  { %3588 = sst [smem:[#allocation21_spill]] %s3563_s0 }
   0x2   :  { %3589 = sst [smem:[#allocation22_spill]] %s3564_s1 }
   0x3   :  { %3590 = sst [smem:[#allocation23_spill]] %s3565_s2 }
   0x4   :  { %3591 = sst [smem:[#allocation24_spill]] %s3571_s8 }
   0x5   :  { %3592 = sst [smem:[#allocation25_spill]] %s3575_s12 }
   0x6   :  { %3593 = sst [smem:[#allocation26_spill]] %s3577_s14 }
   0x7   :  { %23 = vsyncpa [#allocation3], 0 }
   0x8   :  { %24 = vsyncpa [#allocation5], 0 }
   0x9   :  { %25 = vsyncpa [#allocation8], 0 }
   0xa   :  { %26 = vsyncpa [#allocation11], 0 }
   0xb   :  { %27 = vsyncpa [#allocation14], 0  ;;  %s3054_s27 = smov 0  }
   0xc LB: > { %3594 = sst [smem:[#allocation20_spill]] %s2937_s27  ;;  %s3063_s0 = sadd.s32 4294967295, %s2937_s27   ;;  %s2937_s27 = sphi %s3054_s27, %s33_s27  }
   0xd   : > { %s3595_s8 = sld [smem:[#allocation24_spill]]  ;;  %p2422_p0 = scmp.ge.s32.totalorder %s2937_s27, 1 }
   0xe   : > { %p452_p1 = scmp.lt.s32.totalorder %s2937_s27, 3  ;;  %p2567_p2 = scmp.eq.s32.totalorder %s3063_s0, 0 }
   0xf   : > { %s2939_s1 = smov [#allocation4]   ;;  %s3597_s12 = sld [smem:[#allocation25_spill]] }
  0x10   : > { %p3068_p3 = pnand %p2422_p0, %p452_p1  ;;  %s493_s20 = sshll.u32 %s2939_s1, 4  ;;  %s494_s20 = int_to_ptr.vmem [resolvable:$true] %s493_s20 }
  0x11   : > { %s2940_s24 = smov [#allocation7]   ;;  %s3599_s14 = sld [smem:[#allocation26_spill]] }
  0x12   : > { %p2542_p4 = pneg %p3068_p3  ;;  %s524_s25 = sshll.u32 %s2940_s24, 4  ;;  %s525_s25 = int_to_ptr.vmem [resolvable:$true] %s524_s25 }
  0x13   : > { %s491_s30 = sshll.u32 %s3595_s8, 4  ;;  %s2941_s1 = smov 128   ;;  %s492_s30 = int_to_ptr.hbm [resolvable:$true] %s491_s30 }
  0x14   : > { %p3079_p5 = pnand %p2567_p2, %p2542_p4  ;;  %s2942_s21 = smov 8  }
  0x15   : > { %s522_s2 = sshll.u32 %s3597_s12, 4  ;;  %s2943_s22 = smov [#allocation10]   ;;  %s523_s2 = int_to_ptr.hbm [resolvable:$true] %s522_s2 }
  0x16   : > { %2548 = dma.hbm_to_vmem [thread:$0]  (!%p3079_p5), %s492_s30, 64, %s494_s20, [#allocation5]  }
  0x17   : > { %s550_s29 = sshll.u32 %s3599_s14, 4  ;;  %s552_s8 = sshll.u32 %s2943_s22, 4  ;;  %s551_s29 = int_to_ptr.hbm [resolvable:$true] %s550_s29  ;;  %s553_s8 = int_to_ptr.vmem [resolvable:$true] %s552_s8 }
  0x18   : > { %2554 = dma.hbm_to_vmem [thread:$0]  (!%p3079_p5), %s523_s2, 512, %s525_s25, [#allocation8], %s2941_s1, %s2941_s1, %s2942_s21  }
  0x19   : > { %s3600_s27 = sld [smem:[#allocation23_spill]]  ;;  %s508_s28 = sshll.u32 %s3574_s11, 4  ;;  %s509_s28 = int_to_ptr.hbm [resolvable:$true] %s508_s28 }
  0x1a   : > { %2560 = dma.hbm_to_vmem [thread:$0]  (!%p3079_p5), %s551_s29, 512, %s553_s8, [#allocation11], %s2941_s1, %s2941_s1, %s2942_s21  }
  0x1b   : > { %s2944_s2 = smov [#allocation2]   ;;  %s2945_s12 = smov [#allocation6]  }
  0x1c   : > { %s466_s25 = sshll.u32 %s2944_s2, 4  ;;  %s536_s14 = sshll.u32 %s3576_s13, 4  ;;  %s467_s25 = int_to_ptr.vmem [resolvable:$true] %s466_s25  ;;  %s537_s14 = int_to_ptr.hbm [resolvable:$true] %s536_s14 }
  0x1d   : > { %s567_s30 = sshll.u32 %s3579_s16, 4  ;;  %s2947_s2 = smov [#allocation12]   ;;  %s568_s30 = int_to_ptr.hbm [resolvable:$true] %s567_s30 }
  0x1f   : > { %s464_s26 = sshll.u32 %s3600_s27, 4  ;;  %s510_s27 = sshll.u32 %s2945_s12, 4  ;;  %s465_s26 = int_to_ptr.hbm [resolvable:$true] %s464_s26  ;;  %s511_s27 = int_to_ptr.vmem [resolvable:$true] %s510_s27 }
  0x20   : > { %2545 = dma.hbm_to_vmem [thread:$0]  (!%p3079_p5), %s465_s26, 64, %s467_s25, [#allocation3]  }
  0x21   : > { %2551 = dma.hbm_to_vmem [thread:$0]  (!%p3079_p5), %s509_s28, 512, %s511_s27, [#allocation5], %s2941_s1, %s2941_s1, %s2942_s21  }
  0x22   : > { %s2946_s26 = smov [#allocation9]   ;;  %s569_s25 = sshll.u32 %s2947_s2, 4  ;;  %s570_s25 = int_to_ptr.vmem [resolvable:$true] %s569_s25 }
  0x23   : > { %s538_s20 = sshll.u32 %s2946_s26, 4  ;;  %s581_s28 = sshll.u32 %s3580_s17, 4  ;;  %s539_s20 = int_to_ptr.vmem [resolvable:$true] %s538_s20  ;;  %s582_s28 = int_to_ptr.hbm [resolvable:$true] %s581_s28 }
  0x24   : > { %2557 = dma.hbm_to_vmem [thread:$0]  (!%p3079_p5), %s537_s14, 512, %s539_s20, [#allocation8], %s2941_s1, %s2941_s1, %s2942_s21  }
  0x25   : > { %2563 = dma.hbm_to_vmem [thread:$0]  (!%p3079_p5), %s568_s30, 512, %s570_s25, [#allocation11], %s2941_s1, %s2941_s1, %s2942_s21  }
  0x26   : > { %s2948_s27 = smov [#allocation13]   ;;  %613 = sbr.rel (%p3068_p3) target bundleno = 5186 (0x1442), region = 92 }
  0x27   : > { %s583_s24 = sshll.u32 %s2948_s27, 4  ;;  %s584_s24 = int_to_ptr.vmem [resolvable:$true] %s583_s24 }
  0x28   : > { %2566 = dma.hbm_to_vmem [thread:$0]  (!%p3079_p5), %s582_s28, 384, %s584_s24, [#allocation14], %s2941_s1, %s2941_s1, %s2942_s21  }
  0x2b   : > { %2916 = dma.done.wait (%p2567_p2), [#allocation3], 64  }
  0x2c   : > { %2918 = vsyncadd (%p2567_p2), [#allocation3], 4294967232 }
  0x2d   : > { %2920 = dma.done.wait (%p2567_p2), [#allocation5], 576  }
  0x2e   : > { %2922 = vsyncadd (%p2567_p2), [#allocation5], 4294966720 }
  0x2f   : > { %2924 = dma.done.wait (%p2567_p2), [#allocation8], 1024  }
  0x30   : > { %2926 = vsyncadd (%p2567_p2), [#allocation8], 4294966272 }
  0x31   : > { %2928 = dma.done.wait (%p2567_p2), [#allocation11], 1024  }
  0x32   : > { %2930 = vsyncadd (%p2567_p2), [#allocation11], 4294966272 }
  0x33   : > { %2932 = dma.done.wait (%p2567_p2), [#allocation14], 384  }
  0x34   : > { %2934 = vsyncadd (%p2567_p2), [#allocation14], 4294966912  ;;  %p705_p6 = scmp.lt.s32.totalorder %s3063_s0, 1  ;;  %vm729_vm0 = vcmask 1043456   ;;  %s3601_s1 = sld [smem:[#allocation21_spill]]  ;;  %vm725_vm1 = vcmask 31744   ;;  %v799_v20 = vlaneseq }
  0x35   : > { %v723_v0 = vld [vmem:[#allocation2] sm:$0xf]  ;;  %v756_v2 = vld [vmem:[%s3566_s3 + $0x18] sm:$0xff]  ;;  %v755_v3 = vld [vmem:[%s3566_s3 + $0x10] sm:$0xff]  ;;  %s2949_s28 = smov 32   ;;  %s2950_s27 = smov 64  }
  0x36   : > { %s3614_s0 = smov (!%p705_p6, %s3063_s0), 1  ;;  %2444 = vmatpush.msk.msra.mxu0 %vm729_vm0, %v723_v0  ;;  %777 = vmatpush.msra.mxu1 %v756_v2  ;;  %v754_v4 = vld [vmem:[%s3566_s3 + $0x8] sm:$0xff]  ;;  %v753_v5 = vld [vmem:[%s3566_s3] sm:$0xff]  ;;  %vm761_vm2 = vcmask 261120   ;;  %s2951_s24 = smov 88   ;;  %vm804_vm3 = vcmask 64512  }
  0x37   : > { %s3159_s14 = sshll.u32 %s3614_s0, 3  ;;  %v3182_v6 = vld [vmem:[%s3570_s7] sm:$0xff]  ;;  %s2952_s19 = smov 120   ;;  %v3208_v22 = vand.u32 127, %v799_v20 }
  0x38   : > { %778 = vmatpush.msra.mxu1 %v755_v3  ;;  %v787_v7 = vperm.slane %v3182_v6, 2  ;;  %v793_v8 = vperm.slane %v3182_v6, 3  ;;  %v724_v9 = vperm.slane %v3182_v6, 0  ;;  %v785_v12 = vperm.slane %v3182_v6, 1  ;;  %s2953_s23 = smov 96   ;;  %s3583_s8 = smov 112  }
  0x39   : > { %vm918_vm4 = vcmp.ge.s32.totalorder %v3208_v22, 8  ;;  %vm919_vm5 = vcmp.lt.s32.totalorder %v3208_v22, 16  ;;  %vm1023_vm6 = vcmp.ge.s32.totalorder %v3208_v22, 16  ;;  %vm1024_vm7 = vcmp.lt.s32.totalorder %v3208_v22, 24  ;;  %s3585_s29 = smov 104   ;;  %s3608_s12 = sld [smem:[#allocation22_spill]] }
  0x3a   : > { %s708_s21 = scalar_lea.vmem %s3601_s1, %s3159_s14  ;;  %779 = vmatpush.msra.mxu1 %v754_v4  ;;  %789 = vrot.lane.b32.xlu0 %v787_v7, %s2949_s28  ;;  %s3587_s1 = smov 80   ;;  %vm1106_vm8 = vcmp.ge.s32.totalorder %v3208_v22, 24  ;;  %vm1107_vm9 = vcmp.lt.s32.totalorder %v3208_v22, 32  ;;  %vm3219_vm10 = vmand %vm918_vm4, %vm919_vm5  ;;  %vm856_vm11 = vcmp.lt.s32.totalorder %v3208_v22, 8 }
  0x3b   : > { %v722_v1 = vld [vmem:[%s708_s21] sm:$0xff]  ;;  %795 = vrot.lane.b32.xlu2 %v793_v8, %s2950_s27  ;;  %s2955_s21 = smov 72   ;;  %vm3224_vm12 = vmand %vm1023_vm6, %vm1024_vm7  ;;  %s3611_s30 = smov 112  }
  0x3c   : > { %2445 = vmatmul.msk.f32.vlgmr.msra.gmra.mxu0 %vm725_vm1, %v722_v1  ;;  %780 = vmatpush.msra.mxu1 %v753_v5  ;;  %vm3228_vm13 = vmand %vm1106_vm8, %vm1107_vm9 }
  0x3f   : > { %s712_s22 = scalar_lea.vmem %s3608_s12, %s3159_s14 }
  0x95   : > { %v796_v17 = vpop.permute.xlu2 %795 }
  0xac   : > { %v790_v13 = vpop.permute.xlu0 %789 }
  0xb9   : > { %v750_v10 = vpop.f32.mrf.mxu0 }
  0xba   : > { %v3189_v11 = vadd.f32 %v750_v10, %v724_v9 }
  0xbc   : > { %2446 = vmatmul.msk.f32.vlgmr.msra.gmra.mxu1 %vm761_vm2, %v3189_v11 }
 0x139   : > { %v782_v14 = vpop.f32.mrf.mxu1 }
 0x13a   : > { %v3194_v15 = vadd.f32 %v785_v12, %v782_v14  ;;  %v792_v16 = vadd.f32 %v790_v13, %v782_v14  ;;  %v798_v18 = vadd.f32 %v796_v17, %v782_v14 }
 0x13c   : > { %867 = vrot.lane.b32.xlu0 %v792_v16, %s2951_s24  ;;  %865 = vrot.lane.b32.xlu1 %v3194_v15, %s2952_s19 }
 0x144   : > { %802 = vrot.lane.b32.xlu0 %v792_v16, %s2953_s23 }
 0x14c   : > { %861 = vrot.lane.b32.xlu0 %v798_v18, %s2950_s27 }
 0x154   : > { %972 = vrot.lane.b32.xlu0 %v792_v16, %s3587_s1 }
 0x15c   : > { %1055 = vrot.lane.b32.xlu0 %v792_v16, %s2955_s21 }
 0x164   : > { %970 = vrot.lane.b32.xlu0 %v3194_v15, %s3583_s8 }
 0x1ae   : > { %v868_v19 = vpop.permute.xlu0 %867  ;;  %v866_v21 = vpop.permute.xlu1 %865 }
 0x1af   : > { %2449 = vmatpush.xpose.msk.msra.mxu3 %vm804_vm3, %v868_v19 }
 0x1b2   : > { %2450 = vmatmul.msk.f32.vlgmr.msra.gmra.mxu3 %vm804_vm3, %v866_v21 }
 0x1b6   : > { %v803_v23 = vpop.permute.xlu0 %802 }
 0x1b7   : > { %2447 = vmatpush.xpose.msk.msrb.mxu1 %vm804_vm3, %v803_v23 }
 0x1ba   : > { %2448 = vmatmul.msk.f32.vlgmr.msrb.gmra.mxu1 %vm804_vm3, %v3194_v15 }
 0x1be   : > { %v862_v27 = vpop.permute.xlu0 %861 }
 0x1bf   : > { %2451 = vmatpush.msk.msrb.mxu0 %vm3219_vm10, %v862_v27  ;;  %2453 = vmatpush.msk.msra.mxu2 %vm856_vm11, %v862_v27 }
 0x1c0   : > { %2457 = vmatpush.msk.msra.mxu1 %vm3224_vm12, %v862_v27 }
 0x1c1   : > { %2461 = vmatpush.msk.msrb.mxu2 %vm3228_vm13, %v862_v27 }
 0x1c6   : > { %v973_v28 = vpop.permute.xlu0 %972 }
 0x1c7   : > { %2455 = vmatpush.xpose.msk.msrb.mxu3 %vm804_vm3, %v973_v28 }
 0x1ce   : > { %v1056_v29 = vpop.permute.xlu0 %1055 }
 0x1cf   : > { %2459 = vmatpush.xpose.msk.msra.mxu0 %vm804_vm3, %v1056_v29 }
 0x1d6   : > { %v971_v30 = vpop.permute.xlu0 %970 }
 0x1d7   : > { %2456 = vmatmul.msk.f32.vlgmr.msrb.gmra.mxu3 %vm804_vm3, %v971_v30 }
 0x235   : > { %v890_v31 = vpop.f32.mrf.mxu3 }
 0x236   : > { %v893_v32 = vmul.f32 0.35355338, %v890_v31 }
 0x237   : > { %v827_v34 = vpop.f32.mrf.mxu1 }
 0x238   : > { %v894_v33 = vsel %vm804_vm3, %v893_v32, -inf  ;;  %v830_v35 = vmul.f32 0.35355338, %v827_v34 }
 0x239   : > { %895 = vmax.xlane.f32.xlu1 %v894_v33 }
 0x23a   : > { %v831_v36 = vsel %vm804_vm3, %v830_v35, -inf }
 0x241   : > { %832 = vmax.xlane.f32.xlu1 %v831_v36 }
 0x25a   : > { %v995_v37 = vpop.f32.mrf.mxu3 }
 0x25b   : > { %v998_v38 = vmul.f32 0.35355338, %v995_v37 }
 0x25d   : > { %v999_v39 = vsel %vm804_vm3, %v998_v38, -inf }
 0x25e   : > { %1000 = vmax.xlane.f32.xlu1 %v999_v39 }
 0x2ac   : > { %v896_v40 = vpop.xlane.xlu1 %895 }
 0x2ad   : > { %v897_v41 = vsub.f32 %v893_v32, %v896_v40 }
 0x2af   : > { %v898_v42 = vmul.f32 1.442695, %v897_v41 }
 0x2b1   : > { %2611 = vpow2.f32 %v898_v42 }
 0x2b4   : > { %v833_v43 = vpop.xlane.xlu1 %832 }
 0x2b5   : > { %v834_v44 = vsub.f32 %v830_v35, %v833_v43 }
 0x2b7   : > { %v2612_v45 = vpop.eup %2611  ;;  %v835_v46 = vmul.f32 1.442695, %v834_v44  ;;  %v1284_v44 = vld [vmem:[#allocation4] sm:$0xf] }
 0x2b8   : > { %v900_v47 = vsel %vm804_vm3, %v2612_v45, 0.0 }
 0x2b9   : > { %2613 = vpow2.f32 %v835_v46  ;;  %901 = vadd.xlane.f32.xlu2 %v900_v47  ;;  %v759_v46 = vld [vmem:[%s3567_s4 + $0x10] sm:$0xff] }
 0x2bf   : > { %v2614_v48 = vpop.eup %2613 }
 0x2c0   : > { %v837_v49 = vsel %vm804_vm3, %v2614_v48, 0.0 }
 0x2c1   : > { %838 = vadd.xlane.f32.xlu1 %v837_v49 }
 0x2d1   : > { %1053 = vrot.lane.b32.xlu2 %v3194_v15, %s3585_s29  ;;  %v1001_v50 = vpop.xlane.xlu1 %1000 }
 0x2d2   : > { %v1002_v51 = vsub.f32 %v998_v38, %v1001_v50 }
 0x2d4   : > { %v1003_v52 = vmul.f32 1.442695, %v1002_v51 }
 0x2d6   : > { %2615 = vpow2.f32 %v1003_v52 }
 0x2dc   : > { %v2616_v53 = vpop.eup %2615 }
 0x2dd   : > { %v1005_v54 = vsel %vm804_vm3, %v2616_v53, 0.0 }
 0x2de   : > { %1006 = vadd.xlane.f32.xlu1 %v1005_v54 }
 0x32c   : > { %v902_v55 = vpop.xlane.xlu2 %901 }
 0x32d   : > { %2617 = vrcp.f32 %v902_v55  ;;  %v914_v60 = vand.u32 2147483648, %v902_v55  ;;  %v912_v62 = vand.u32 2147483647, %v902_v55  ;;  %vm908_vm15 = vweird.f32 %v902_v55 }
 0x32f   : > { %v915_v1 = vor.u32 1.1754944e-38, %v914_v60  ;;  %vm913_vm5 = vcmp.eq.f32.partialorder %v912_v62, 8.507059e+37  ;;  %v758_v60 = vld [vmem:[%s3567_s4 + $0x8] sm:$0xff]  ;;  %v1315_v62 = vld [vmem:[%s3572_s9 + $0x18] sm:$0xff] }
 0x333   : > { %v2618_v56 = vpop.eup %2617 }
 0x334   : > { %v904_v57 = vmul.f32 %v2618_v56, %v902_v55  ;;  %v839_v58 = vpop.xlane.xlu1 %838  ;;  %vm909_vm14 = vweird.f32 %v2618_v56  ;;  %v1054_v17 = vpop.permute.xlu2 %1053 }
 0x335   : > { %2619 = vrcp.f32 %v839_v58  ;;  %vm910_vm4 = vmor %vm908_vm15, %vm909_vm14  ;;  %v851_v8 = vand.u32 2147483648, %v839_v58  ;;  %v849_v10 = vand.u32 2147483647, %v839_v58  ;;  %vm845_vm7 = vweird.f32 %v839_v58 }
 0x336   : > { %v905_v59 = vsub.f32 1.0, %v904_v57 }
 0x337   : > { %v852_v13 = vor.u32 1.1754944e-38, %v851_v8  ;;  %vm850_vm9 = vcmp.eq.f32.partialorder %v849_v10, 8.507059e+37 }
 0x338   : > { %v906_v61 = vmul.f32 %v2618_v56, %v905_v59  ;;  %v1283_v59 = vld [vmem:[%s712_s22] sm:$0xff] }
 0x33a   : > { %v907_v63 = vadd.f32 %v2618_v56, %v906_v61  ;;  %v757_v61 = vld [vmem:[%s3567_s4] sm:$0xff] }
 0x33b   : > { %v2620_v0 = vpop.eup %2619 }
 0x33c   : > { %v841_v2 = vmul.f32 %v2620_v0, %v839_v58  ;;  %v911_v3 = vsel %vm910_vm4, %v2618_v56, %v907_v63  ;;  %vm846_vm6 = vweird.f32 %v2620_v0  ;;  %v1314_v63 = vld [vmem:[%s3572_s9 + $0x10] sm:$0xff] }
 0x33d   : > { %v916_v4 = vsel %vm913_vm5, %v915_v1, %v911_v3  ;;  %vm847_vm8 = vmor %vm845_vm7, %vm846_vm6  ;;  %v1312_v1 = vld [vmem:[%s3572_s9] sm:$0xff] }
 0x33e   : > { %v842_v5 = vsub.f32 1.0, %v841_v2  ;;  %v917_v7 = vmul.f32 %v2612_v45, %v916_v4  ;;  %v760_v45 = vld [vmem:[%s3567_s4 + $0x18] sm:$0xff]  ;;  %v3288_v2 = vld [vmem:[#allocation13] sm:$0xff] }
 0x33f   : > { %1152 = vmatpush.msra.mxu3 %v760_v45  ;;  %v1345_v3 = vperm.slane %v3288_v2, 2 }
 0x340   : > { %v843_v9 = vmul.f32 %v2620_v0, %v842_v5  ;;  %2452 = vmatmul.msk.f32.vlgmr.msrb.gmra.mxu0 %vm804_vm3, %v917_v7 }
 0x341   : > { %1153 = vmatpush.msra.mxu3 %v759_v46  ;;  %1347 = vrot.lane.b32.xlu1 %v1345_v3, %s2949_s28  ;;  %v1197_v46 = vld [vmem:[%s3568_s5 + $0x18] sm:$0xff]  ;;  %v1192_v3 = vperm.slane %v3182_v6, 6 }
 0x342   : > { %v844_v12 = vadd.f32 %v2620_v0, %v843_v9  ;;  %1222 = vmatpush.msrb.mxu1 %v1197_v46 }
 0x343   : > { %1154 = vmatpush.msra.mxu3 %v758_v60 }
 0x344   : > { %v848_v14 = vsel %vm847_vm8, %v2620_v0, %v844_v12  ;;  %v1313_v0 = vld [vmem:[%s3572_s9 + $0x8] sm:$0xff]  ;;  %v1285_v12 = vperm.slane %v3288_v2, 0 }
 0x345   : > { %v853_v15 = vsel %vm850_vm9, %v852_v13, %v848_v14  ;;  %1155 = vmatpush.msra.mxu3 %v757_v61 }
 0x346   : > { %v854_v16 = vmul.f32 %v2614_v48, %v853_v15  ;;  %v1136_v15 = vperm.slane %v3182_v6, 4 }
 0x347   : > { %1335 = vmatpush.msrb.mxu3 %v1315_v62 }
 0x348   : > { %2454 = vmatmul.msk.f32.vlgmr.msra.gmra.mxu2 %vm804_vm3, %v854_v16  ;;  %2460 = vmatmul.msk.f32.vlgmr.msra.gmra.mxu0 %vm804_vm3, %v1054_v17 }
 0x349   : > { %2466 = vmatpush.msk.msra.mxu2 %vm729_vm0, %v1284_v44  ;;  %1336 = vmatpush.msrb.mxu3 %v1314_v63 }
 0x34b   : > { %1337 = vmatpush.msrb.mxu3 %v1313_v0 }
 0x34d   : > { %1338 = vmatpush.msrb.mxu3 %v1312_v1 }
 0x351   : > { %v1007_v18 = vpop.xlane.xlu1 %1006 }
 0x352   : > { %2621 = vrcp.f32 %v1007_v18  ;;  %v1019_v27 = vand.u32 2147483648, %v1007_v18  ;;  %v1017_v29 = vand.u32 2147483647, %v1007_v18  ;;  %vm1013_vm15 = vweird.f32 %v1007_v18 }
 0x354   : > { %v1020_v31 = vor.u32 1.1754944e-38, %v1019_v27  ;;  %vm1018_vm5 = vcmp.eq.f32.partialorder %v1017_v29, 8.507059e+37 }
 0x358   : > { %v2622_v19 = vpop.eup %2621 }
 0x359   : > { %v1009_v21 = vmul.f32 %v2622_v19, %v1007_v18  ;;  %vm1014_vm14 = vweird.f32 %v2622_v19 }
 0x35a   : > { %vm1015_vm4 = vmor %vm1013_vm15, %vm1014_vm14 }
 0x35b   : > { %v1010_v23 = vsub.f32 1.0, %v1009_v21  ;;  %v1343_v21 = vperm.slane %v3288_v2, 1 }
 0x35d   : > { %v1011_v28 = vmul.f32 %v2622_v19, %v1010_v23 }
 0x35f   : > { %v1012_v30 = vadd.f32 %v2622_v19, %v1011_v28 }
 0x361   : > { %v1016_v32 = vsel %vm1015_vm4, %v2622_v19, %v1012_v30  ;;  %v1351_v30 = vperm.slane %v3288_v2, 3 }
 0x362   : > { %v1021_v33 = vsel %vm1018_vm5, %v1020_v31, %v1016_v32  ;;  %vm1232_vm5 = vcmask 523264  }
 0x363   : > { %v1022_v34 = vmul.f32 %v2616_v53, %v1021_v33 }
 0x365   : > { %2458 = vmatmul.msk.f32.vlgmr.msra.gmra.mxu1 %vm804_vm3, %v1022_v34 }
 0x3b3   : > { %v1348_v23 = vpop.permute.xlu1 %1347 }
 0x3bd   : > { %v944_v35 = vpop.f32.mrf.mxu0 }
 0x3c5   : > { %v1078_v36 = vpop.f32.mrf.mxu0 }
 0x3c6   : > { %v1081_v37 = vmul.f32 0.35355338, %v1078_v36 }
 0x3c8   : > { %v1082_v38 = vsel %vm804_vm3, %v1081_v37, -inf }
 0x3c9   : > { %1083 = vmax.xlane.f32.xlu0 %v1082_v38 }
 0x3cb   : > { %v967_v4 = vpop.f32.mrf.mxu2 }
 0x3cc   : > { %v968_v7 = vadd.f32 %v967_v4, %v944_v35 }
 0x3e2   : > { %v1049_v5 = vpop.f32.mrf.mxu1 }
 0x3e3   : > { %v1052_v8 = vadd.f32 %v1049_v5, %v968_v7 }
 0x43c   : > { %v1084_v39 = vpop.xlane.xlu0 %1083 }
 0x43d   : > { %v1085_v40 = vsub.f32 %v1081_v37, %v1084_v39 }
 0x43f   : > { %v1086_v41 = vmul.f32 1.442695, %v1085_v40 }
 0x441   : > { %2623 = vpow2.f32 %v1086_v41 }
 0x447   : > { %v2624_v42 = vpop.eup %2623 }
 0x448   : > { %v1088_v43 = vsel %vm804_vm3, %v2624_v42, 0.0 }
 0x449   : > { %1089 = vadd.xlane.f32.xlu2 %v1088_v43 }
 0x4bc   : > { %v1090_v47 = vpop.xlane.xlu2 %1089 }
 0x4bd   : > { %2625 = vrcp.f32 %v1090_v47  ;;  %v1102_v51 = vand.u32 2147483648, %v1090_v47  ;;  %v1100_v53 = vand.u32 2147483647, %v1090_v47  ;;  %vm1096_vm0 = vweird.f32 %v1090_v47 }
 0x4bf   : > { %v1103_v55 = vor.u32 1.1754944e-38, %v1102_v51  ;;  %vm1101_vm8 = vcmp.eq.f32.partialorder %v1100_v53, 8.507059e+37 }
 0x4c3   : > { %v2626_v48 = vpop.eup %2625 }
 0x4c4   : > { %v1092_v49 = vmul.f32 %v2626_v48, %v1090_v47  ;;  %vm1097_vm6 = vweird.f32 %v2626_v48  ;;  %v1196_v47 = vld [vmem:[%s3568_s5 + $0x10] sm:$0xff] }
 0x4c5   : > { %vm1098_vm7 = vmor %vm1096_vm0, %vm1097_vm6  ;;  %1223 = vmatpush.msrb.mxu1 %v1196_v47 }
 0x4c6   : > { %v1093_v50 = vsub.f32 1.0, %v1092_v49  ;;  %v1194_v49 = vld [vmem:[%s3568_s5] sm:$0xff] }
 0x4c8   : > { %v1094_v52 = vmul.f32 %v2626_v48, %v1093_v50 }
 0x4ca   : > { %v1095_v54 = vadd.f32 %v2626_v48, %v1094_v52 }
 0x4cc   : > { %v1099_v56 = vsel %vm1098_vm7, %v2626_v48, %v1095_v54  ;;  %v1195_v48 = vld [vmem:[%s3568_s5 + $0x8] sm:$0xff] }
 0x4cd   : > { %v1104_v57 = vsel %vm1101_vm8, %v1103_v55, %v1099_v56  ;;  %1224 = vmatpush.msrb.mxu1 %v1195_v48  ;;  %v3335_v55 = vshrl.u32 %v799_v20, 7  ;;  %v1190_v20 = vperm.slane %v3182_v6, 5 }
 0x4ce   : > { %v1105_v58 = vmul.f32 %v2624_v42, %v1104_v57 }
 0x4cf   : > { %1225 = vmatpush.msrb.mxu1 %v1194_v49  ;;  %vm1359_vm9 = vcmp.le.s32.totalorder %v3208_v22, %v3335_v55 }
 0x4d0   : > { %2462 = vmatmul.msk.f32.vlgmr.msrb.gmra.mxu2 %vm804_vm3, %v1105_v58 }
 0x4d8   : > { %2467 = vmatmul.msk.f32.vlgmr.msra.gmra.mxu2 %vm725_vm1, %v1283_v59 }
 0x553   : > { %v1132_v9 = vpop.f32.mrf.mxu2 }
 0x554   : > { %v1135_v10 = vadd.f32 %v1132_v9, %v1052_v8  ;;  %v1205_v9 = vld [vmem:[%s3569_s6 + $0x38] sm:$0xff] }
 0x555   : > { %1244 = vmatpush.msrb.mxu0 %v1205_v9  ;;  %v3418_v9 = vld [vmem:[%s3570_s7 + $0x8] sm:$0x7] }
 0x556   : > { %2463 = vmatmul.msk.f32.vlgmr.msra.gmra.mxu3 %vm761_vm2, %v1135_v10  ;;  %v1204_v10 = vld [vmem:[%s3569_s6 + $0x30] sm:$0xff] }
 0x557   : > { %1245 = vmatpush.msrb.mxu0 %v1204_v10  ;;  %v1231_v10 = vperm.slane %v3418_v9, 0 }
 0x55b   : > { %v1309_v13 = vpop.f32.mrf.mxu2 }
 0x55c   : > { %v3294_v14 = vadd.f32 %v1309_v13, %v1285_v12  ;;  %v1203_v12 = vld [vmem:[%s3569_s6 + $0x28] sm:$0xff]  ;;  %v1202_v13 = vld [vmem:[%s3569_s6 + $0x20] sm:$0xff] }
 0x55d   : > { %1246 = vmatpush.msrb.mxu0 %v1203_v12 }
 0x55e   : > { %2468 = vmatmul.msk.f32.vlgmr.msrb.gmra.mxu3 %vm761_vm2, %v3294_v14 }
 0x55f   : > { %1247 = vmatpush.msrb.mxu0 %v1202_v13 }
 0x5d9   : > { %v1157_v16 = vpop.f32.mrf.mxu3 }
 0x5da   : > { %v1158_v17 = vadd.f32 %v1157_v16, %v1136_v15  ;;  %v1201_v15 = vld [vmem:[%s3569_s6 + $0x18] sm:$0xff]  ;;  %v1200_v16 = vld [vmem:[%s3569_s6 + $0x10] sm:$0xff] }
 0x5db   : > { %1248 = vmatpush.msrb.mxu0 %v1201_v15 }
 0x5dc   : > { %v1160_v18 = vadd.f32 %v1158_v17, %v3189_v11  ;;  %v2958_v11 = vmov 32.0   ;;  %v1199_v17 = vld [vmem:[%s3569_s6 + $0x8] sm:$0xff] }
 0x5dd   : > { %2627 = vrcp.f32 %v2958_v11  ;;  %1249 = vmatpush.msrb.mxu0 %v1200_v16 }
 0x5de   : > { %v1161_v19 = vsel %vm761_vm2, %v1160_v18, 0.0 }
 0x5df   : > { %1162 = vadd.xlane.f32.xlu2 %v1161_v19  ;;  %1250 = vmatpush.msrb.mxu0 %v1199_v17 }
 0x5e1   : > { %v1340_v27 = vpop.f32.mrf.mxu3 }
 0x5e2   : > { %v3302_v28 = vadd.f32 %v1343_v21, %v1340_v27  ;;  %v3304_v29 = vadd.f32 %v1348_v23, %v1340_v27 }
 0x5e3   : > { %v2628_v31 = vpop.eup %2627 }
 0x5e4   : > { %1419 = vrot.lane.b32.xlu1 %v3302_v28, %s2952_s19  ;;  %1421 = vrot.lane.b32.xlu0 %v3304_v29, %s2951_s24  ;;  %v1165_v32 = vmul.f32 32.0, %v2628_v31  ;;  %vm1169_vm1 = vweird.f32 %v2628_v31 }
 0x5e6   : > { %v1166_v33 = vsub.f32 1.0, %v1165_v32 }
 0x5e8   : > { %v1167_v34 = vmul.f32 %v2628_v31, %v1166_v33 }
 0x5ea   : > { %v1168_v35 = vadd.f32 %v2628_v31, %v1167_v34 }
 0x5ec   : > { %v3312_v36 = vsel %vm1169_vm1, %v2628_v31, %v1168_v35 }
 0x5f7   : > { %1353 = vrot.lane.b32.xlu2 %v1351_v30, %s2950_s27  ;;  %v1206_v30 = vperm.slane %v3182_v6, 7 }
 0x652   : > { %v1163_v37 = vpop.xlane.xlu2 %1162 }
 0x653   : > { %v1171_v38 = vmul.f32 %v3312_v36, %v1163_v37 }
 0x655   : > { %v1172_v39 = vsub.f32 %v1160_v18, %v1171_v38  ;;  %v1198_v18 = vld [vmem:[%s3569_s6] sm:$0xff] }
 0x656   : > { %v1422_v40 = vpop.permute.xlu0 %1421  ;;  %v1420_v42 = vpop.permute.xlu1 %1419  ;;  %1251 = vmatpush.msrb.mxu0 %v1198_v18 }
 0x657   : > { %2471 = vmatpush.xpose.msk.msrb.mxu2 %vm804_vm3, %v1422_v40  ;;  %v1173_v41 = vmul.f32 %v1172_v39, %v1172_v39 }
 0x659   : > { %v1174_v43 = vsel %vm761_vm2, %v1173_v41, 0.0 }
 0x65a   : > { %1175 = vadd.xlane.f32.xlu1 %v1174_v43  ;;  %2472 = vmatmul.msk.f32.vlgmr.msrb.gmra.mxu2 %vm804_vm3, %v1420_v42  ;;  %v1354_v44 = vpop.permute.xlu2 %1353 }
 0x65b   : > { %v1356_v45 = vadd.f32 %v1354_v44, %v1340_v27 }
 0x673   : > { %1415 = vrot.lane.b32.xlu1 %v1356_v45, %s2950_s27  ;;  %s3609_s27 = smov 80  }
 0x67b   : > { %1601 = vrot.lane.b32.xlu1 %v3304_v29, %s2955_s21  ;;  %s3610_s21 = smov 104  }
 0x6cd   : > { %v1176_v50 = vpop.xlane.xlu1 %1175 }
 0x6ce   : > { %v1177_v51 = vmul.f32 %v1176_v50, %v3312_v36 }
 0x6d0   : > { %v1178_v52 = vadd.f32 1e-05, %v1177_v51 }
 0x6d2   : > { %2629 = vrsqrt.f32 %v1178_v52  ;;  %vm1185_vm15 = vweird.f32 %v1178_v52 }
 0x6d8   : > { %v2630_v53 = vpop.eup %2629 }
 0x6d9   : > { %v1180_v54 = vmul.f32 %v2630_v53, %v1178_v52  ;;  %vm1186_vm14 = vweird.f32 %v2630_v53 }
 0x6da   : > { %vm1187_vm4 = vmor %vm1185_vm15, %vm1186_vm14 }
 0x6db   : > { %v1181_v56 = vmul.f32 %v2630_v53, %v1180_v54 }
 0x6dd   : > { %v1182_v57 = vmul.f32 0.5, %v1181_v56  ;;  %v1444_v58 = vpop.f32.mrf.mxu2 }
 0x6de   : > { %v1447_v59 = vmul.f32 0.35355338, %v1444_v58 }
 0x6df   : > { %v1183_v60 = vsub.f32 1.5, %v1182_v57 }
 0x6e0   : > { %v1448_v61 = vsel %vm1359_vm9, %v1447_v59, -1e+30 }
 0x6e1   : > { %v1184_v62 = vmul.f32 %v2630_v53, %v1183_v60  ;;  %v1449_v63 = vsel %vm804_vm3, %v1448_v61, -inf }
 0x6e2   : > { %1450 = vmax.xlane.f32.xlu0 %v1449_v63 }
 0x6e3   : > { %v1188_v0 = vsel %vm1187_vm4, %v2630_v53, %v1184_v62 }
 0x6e4   : > { %v1189_v1 = vmul.f32 %v1188_v0, %v1172_v39 }
 0x6e5   : > { %v1416_v4 = vpop.permute.xlu1 %1415 }
 0x6e6   : > { %v1191_v5 = vmul.f32 %v1190_v20, %v1189_v1  ;;  %2473 = vmatpush.msk.msra.mxu3 %vm3219_vm10, %v1416_v4  ;;  %2479 = vmatpush.msk.msra.mxu2 %vm3224_vm12, %v1416_v4 }
 0x6e8   : > { %v3349_v7 = vadd.f32 %v1192_v3, %v1191_v5 }
 0x6ea   : > { %2464 = vmatmul.msk.f32.vlgmr.msrb.gmra.mxu1 %vm761_vm2, %v3349_v7 }
 0x6ed   : > { %v1602_v8 = vpop.permute.xlu1 %1601 }
 0x6ee   : > { %2481 = vmatpush.xpose.msk.msrb.mxu3 %vm804_vm3, %v1602_v8 }
 0x6f6   : > { %1361 = vrot.lane.b32.xlu0 %v3304_v29, %s2953_s23 }
 0x6fe   : > { %1522 = vrot.lane.b32.xlu0 %v3304_v29, %s3609_s27 }
 0x706   : > { %1599 = vrot.lane.b32.xlu0 %v3302_v28, %s3610_s21 }
 0x755   : > { %v1451_v19 = vpop.xlane.xlu0 %1450 }
 0x756   : > { %v1452_v21 = vsub.f32 %v1448_v61, %v1451_v19 }
 0x758   : > { %v1453_v23 = vmul.f32 1.442695, %v1452_v21 }
 0x75a   : > { %2631 = vpow2.f32 %v1453_v23 }
 0x760   : > { %v2632_v27 = vpop.eup %2631 }
 0x761   : > { %v1455_v29 = vsel %vm804_vm3, %v2632_v27, 0.0 }
 0x762   : > { %1456 = vadd.xlane.f32.xlu2 %v1455_v29 }
 0x767   : > { %v1227_v11 = vpop.f32.mrf.mxu1 }
 0x768   : > { %v1228_v31 = vadd.f32 %v1227_v11, %v1206_v30  ;;  %v1362_v32 = vpop.permute.xlu0 %1361 }
 0x769   : > { %2469 = vmatpush.xpose.msk.msra.mxu1 %vm804_vm3, %v1362_v32 }
 0x76a   : > { %v1230_v33 = vmax.f32 %v1228_v31, 0.0 }
 0x76c   : > { %2465 = vmatmul.msk.f32.vlgmr.msrb.gmra.mxu0 %vm1232_vm5, %v1230_v33  ;;  %2470 = vmatmul.msk.f32.vlgmr.msra.gmra.mxu1 %vm804_vm3, %v3302_v28 }
 0x76d   : > { %2475 = vmatpush.msk.msrb.mxu1 %vm856_vm11, %v1416_v4 }
 0x76f   : > { %2483 = vmatpush.msk.msra.mxu1 %vm3228_vm13, %v1416_v4 }
 0x770   : > { %v1523_v34 = vpop.permute.xlu0 %1522 }
 0x771   : > { %2477 = vmatpush.xpose.msk.msra.mxu0 %vm804_vm3, %v1523_v34 }
 0x778   : > { %v1600_v51 = vpop.permute.xlu0 %1599 }
 0x77a   : > { %1520 = vrot.lane.b32.xlu2 %v3302_v28, %s3611_s30 }
 0x7d5   : > { %v1457_v6 = vpop.xlane.xlu2 %1456 }
 0x7d6   : > { %2633 = vrcp.f32 %v1457_v6  ;;  %v1469_v40 = vand.u32 2147483648, %v1457_v6  ;;  %v1467_v42 = vand.u32 2147483647, %v1457_v6  ;;  %vm1463_vm0 = vweird.f32 %v1457_v6 }
 0x7d8   : > { %v1470_v44 = vor.u32 1.1754944e-38, %v1469_v40  ;;  %vm1468_vm8 = vcmp.eq.f32.partialorder %v1467_v42, 8.507059e+37 }
 0x7dc   : > { %v2634_v35 = vpop.eup %2633 }
 0x7dd   : > { %v1459_v37 = vmul.f32 %v2634_v35, %v1457_v6  ;;  %v1521_v38 = vpop.permute.xlu2 %1520  ;;  %vm1464_vm6 = vweird.f32 %v2634_v35 }
 0x7de   : > { %2478 = vmatmul.msk.f32.vlgmr.msra.gmra.mxu0 %vm804_vm3, %v1521_v38  ;;  %vm1465_vm7 = vmor %vm1463_vm0, %vm1464_vm6 }
 0x7df   : > { %v1460_v39 = vsub.f32 1.0, %v1459_v37 }
 0x7e1   : > { %v1461_v41 = vmul.f32 %v2634_v35, %v1460_v39 }
 0x7e3   : > { %v1462_v43 = vadd.f32 %v2634_v35, %v1461_v41 }
 0x7e5   : > { %v1466_v45 = vsel %vm1465_vm7, %v2634_v35, %v1462_v43 }
 0x7e6   : > { %v1471_v46 = vsel %vm1468_vm8, %v1470_v44, %v1466_v45 }
 0x7e7   : > { %v1472_v28 = vmul.f32 %v2632_v27, %v1471_v46 }
 0x7e9   : > { %v1385_v47 = vpop.f32.mrf.mxu1  ;;  %2474 = vmatmul.msk.f32.vlgmr.msra.gmra.mxu3 %vm804_vm3, %v1472_v28  ;;  %v1253_v52 = vpop.f32.mrf.mxu0 }
 0x7ea   : > { %v1388_v48 = vmul.f32 0.35355338, %v1385_v47  ;;  %v1254_v13 = vadd.f32 %v1253_v52, %v1231_v10  ;;  %v1733_v10 = vld [vmem:[#allocation7] sm:$0xff] }
 0x7ec   : > { %v1389_v49 = vsel %vm1359_vm9, %v1388_v48, -1e+30  ;;  %v1256_v16 = vadd.f32 %v1254_v13, %v3349_v7  ;;  %v1318_v13 = vld [vmem:[%s3573_s10 + $0x10] sm:$0xff] }
 0x7ed   : > { %v1390_v50 = vsel %vm804_vm3, %v1389_v49, -inf }
 0x7ee   : > { %1391 = vmax.xlane.f32.xlu1 %v1390_v50  ;;  %v1257_v17 = vsel %vm761_vm2, %v1256_v16, 0.0 }
 0x7f1   : > { %2482 = vmatmul.msk.f32.vlgmr.msrb.gmra.mxu3 %vm804_vm3, %v1600_v51 }
 0x85b   : > { %v1545_v53 = vpop.f32.mrf.mxu0 }
 0x85c   : > { %v1548_v54 = vmul.f32 0.35355338, %v1545_v53 }
 0x85e   : > { %v1549_v56 = vsel %vm1359_vm9, %v1548_v54, -1e+30 }
 0x85f   : > { %v1550_v57 = vsel %vm804_vm3, %v1549_v56, -inf }
 0x860   : > { %1551 = vmax.xlane.f32.xlu0 %v1550_v57 }
 0x861   : > { %v1392_v58 = vpop.xlane.xlu1 %1391 }
 0x862   : > { %v1393_v59 = vsub.f32 %v1389_v49, %v1392_v58 }
 0x864   : > { %v1394_v60 = vmul.f32 1.442695, %v1393_v59 }
 0x866   : > { %2635 = vpow2.f32 %v1394_v60 }
 0x86c   : > { %v2636_v61 = vpop.eup %2635  ;;  %v3408_v62 = vpop.f32.mrf.mxu3 }
 0x86d   : > { %v1396_v63 = vsel %vm804_vm3, %v2636_v61, 0.0 }
 0x86e   : > { %1397 = vadd.xlane.f32.xlu1 %v1396_v63 }
 0x874   : > { %v1624_v20 = vpop.f32.mrf.mxu3 }
 0x875   : > { %v1627_v0 = vmul.f32 0.35355338, %v1624_v20 }
 0x877   : > { %v1628_v1 = vsel %vm1359_vm9, %v1627_v0, -1e+30 }
 0x878   : > { %v1629_v3 = vsel %vm804_vm3, %v1628_v1, -inf }
 0x879   : > { %1630 = vmax.xlane.f32.xlu2 %v1629_v3 }
 0x8d3   : > { %v1552_v4 = vpop.xlane.xlu0 %1551 }
 0x8d4   : > { %v1553_v5 = vsub.f32 %v1549_v56, %v1552_v4  ;;  %v1736_v4 = vld [vmem:[#allocation7 + $0x18] sm:$0xff] }
 0x8d5   : > { %1780 = vmatpush.msra.mxu3 %v1736_v4 }
 0x8d6   : > { %v1554_v8 = vmul.f32 1.442695, %v1553_v5  ;;  %v1735_v5 = vld [vmem:[#allocation7 + $0x10] sm:$0xff] }
 0x8d7   : > { %1781 = vmatpush.msra.mxu3 %v1735_v5 }
 0x8d8   : > { %2637 = vpow2.f32 %v1554_v8  ;;  %v1734_v8 = vld [vmem:[#allocation7 + $0x8] sm:$0xff] }
 0x8d9   : > { %1782 = vmatpush.msra.mxu3 %v1734_v8  ;;  %v1727_v8 = vperm.slane %v3288_v2, 6 }
 0x8db   : > { %1783 = vmatpush.msra.mxu3 %v1733_v10 }
 0x8de   : > { %v2638_v12 = vpop.eup %2637 }
 0x8df   : > { %v1556_v15 = vsel %vm804_vm3, %v2638_v12, 0.0 }
 0x8e0   : > { %1557 = vadd.xlane.f32.xlu0 %v1556_v15 }
 0x8e1   : > { %v1398_v55 = vpop.xlane.xlu1 %1397 }
 0x8e2   : > { %2639 = vrcp.f32 %v1398_v55  ;;  %v1410_v23 = vand.u32 2147483648, %v1398_v55  ;;  %v1408_v30 = vand.u32 2147483647, %v1398_v55  ;;  %vm1404_vm9 = vweird.f32 %v1398_v55 }
 0x8e4   : > { %v1411_v33 = vor.u32 1.1754944e-38, %v1410_v23  ;;  %vm1409_vm15 = vcmp.eq.f32.partialorder %v1408_v30, 8.507059e+37 }
 0x8e8   : > { %v2640_v18 = vpop.eup %2639  ;;  %1258 = vadd.xlane.f32.xlu0 %v1257_v17  ;;  %v1317_v17 = vld [vmem:[%s3573_s10 + $0x8] sm:$0xff] }
 0x8e9   : > { %v1400_v19 = vmul.f32 %v2640_v18, %v1398_v55  ;;  %vm1405_vm1 = vweird.f32 %v2640_v18 }
 0x8ea   : > { %vm1406_vm14 = vmor %vm1404_vm9, %vm1405_vm1 }
 0x8eb   : > { %v1401_v21 = vsub.f32 1.0, %v1400_v19 }
 0x8ec   : > { %v1631_v27 = vpop.xlane.xlu2 %1630 }
 0x8ed   : > { %v1402_v29 = vmul.f32 %v2640_v18, %v1401_v21  ;;  %v1632_v11 = vsub.f32 %v1628_v1, %v1631_v27 }
 0x8ef   : > { %v1403_v31 = vadd.f32 %v2640_v18, %v1402_v29  ;;  %v1633_v32 = vmul.f32 1.442695, %v1632_v11  ;;  %v1279_v11 = vperm.slane %v3418_v9, 1 }
 0x8f1   : > { %v1407_v34 = vsel %vm1406_vm14, %v2640_v18, %v1403_v31  ;;  %2641 = vpow2.f32 %v1633_v32  ;;  %v1316_v18 = vld [vmem:[%s3573_s10] sm:$0xff]  ;;  %v1281_v32 = vperm.slane %v3418_v9, 2 }
 0x8f2   : > { %v1412_v7 = vsel %vm1409_vm15, %v1411_v33, %v1407_v34 }
 0x8f3   : > { %v1413_v6 = vmul.f32 %v2636_v61, %v1412_v7 }
 0x8f5   : > { %2476 = vmatmul.msk.f32.vlgmr.msrb.gmra.mxu1 %vm804_vm3, %v1413_v6 }
 0x8f7   : > { %v2642_v35 = vpop.eup %2641 }
 0x8f8   : > { %v1635_v37 = vsel %vm804_vm3, %v2642_v35, 0.0 }
 0x8f9   : > { %1636 = vadd.xlane.f32.xlu1 %v1635_v37 }
 0x953   : > { %v1558_v38 = vpop.xlane.xlu0 %1557 }
 0x954   : > { %2643 = vrcp.f32 %v1558_v38  ;;  %v1570_v44 = vand.u32 2147483648, %v1558_v38  ;;  %v1568_v28 = vand.u32 2147483647, %v1558_v38  ;;  %vm1564_vm6 = vweird.f32 %v1558_v38 }
 0x956   : > { %v1571_v49 = vor.u32 1.1754944e-38, %v1570_v44  ;;  %vm1569_vm7 = vcmp.eq.f32.partialorder %v1568_v28, 8.507059e+37  ;;  %v1678_v44 = vperm.slane %v3288_v2, 4 }
 0x95a   : > { %v2644_v39 = vpop.eup %2643 }
 0x95b   : > { %v1560_v40 = vmul.f32 %v2644_v39, %v1558_v38  ;;  %v1259_v41 = vpop.xlane.xlu0 %1258  ;;  %vm1565_vm4 = vweird.f32 %v2644_v39 }
 0x95c   : > { %v1260_v42 = vmul.f32 %v1259_v41, %v3312_v36  ;;  %vm1566_vm0 = vmor %vm1564_vm6, %vm1565_vm4  ;;  %v3453_v41 = vld [vmem:[#allocation13 + $0x8] sm:$0xff] }
 0x95d   : > { %v1561_v43 = vsub.f32 1.0, %v1560_v40 }
 0x95e   : > { %v3427_v45 = vsub.f32 %v1256_v16, %v1260_v42  ;;  %v1788_v42 = vperm.slane %v3453_v41, 0 }
 0x95f   : > { %v1562_v46 = vmul.f32 %v2644_v39, %v1561_v43 }
 0x960   : > { %v1262_v47 = vmul.f32 %v3427_v45, %v3427_v45 }
 0x961   : > { %v1563_v48 = vadd.f32 %v2644_v39, %v1562_v46 }
 0x962   : > { %v1263_v50 = vsel %vm761_vm2, %v1262_v47, 0.0 }
 0x963   : > { %v1567_v51 = vsel %vm1566_vm0, %v2644_v39, %v1563_v48  ;;  %1264 = vadd.xlane.f32.xlu2 %v1263_v50 }
 0x964   : > { %v1572_v52 = vsel %vm1569_vm7, %v1571_v49, %v1567_v51 }
 0x965   : > { %v1573_v53 = vmul.f32 %v2638_v12, %v1572_v52  ;;  %v1319_v12 = vld [vmem:[%s3573_s10 + $0x18] sm:$0xff] }
 0x966   : > { %1694 = vmatpush.msrb.mxu0 %v1319_v12 }
 0x967   : > { %2480 = vmatmul.msk.f32.vlgmr.msra.gmra.mxu2 %vm804_vm3, %v1573_v53  ;;  %v1732_v53 = vld [vmem:[#allocation6 + $0x18] sm:$0xff] }
 0x968   : > { %1695 = vmatpush.msrb.mxu0 %v1318_v13  ;;  %1757 = vmatpush.msrb.mxu2 %v1732_v53  ;;  %v1741_v13 = vperm.slane %v3288_v2, 7 }
 0x96a   : > { %1696 = vmatpush.msrb.mxu0 %v1317_v17 }
 0x96c   : > { %v1637_v54 = vpop.xlane.xlu1 %1636  ;;  %1697 = vmatpush.msrb.mxu0 %v1316_v18 }
 0x96d   : > { %2645 = vrcp.f32 %v1637_v54  ;;  %v1649_v59 = vand.u32 2147483648, %v1637_v54  ;;  %v1647_v61 = vand.u32 2147483647, %v1637_v54  ;;  %vm1643_vm1 = vweird.f32 %v1637_v54 }
 0x96f   : > { %v1650_v20 = vor.u32 1.1754944e-38, %v1649_v59  ;;  %vm1648_vm14 = vcmp.eq.f32.partialorder %v1647_v61, 8.507059e+37 }
 0x972   : > { %v1517_v6 = vpop.f32.mrf.mxu1 }
 0x973   : > { %v2646_v56 = vpop.eup %2645  ;;  %v1518_v37 = vadd.f32 %v1517_v6, %v3408_v62 }
 0x974   : > { %v1639_v57 = vmul.f32 %v2646_v56, %v1637_v54  ;;  %vm1644_vm8 = vweird.f32 %v2646_v56  ;;  %v1731_v54 = vld [vmem:[#allocation6 + $0x10] sm:$0xff] }
 0x975   : > { %vm1645_vm9 = vmor %vm1643_vm1, %vm1644_vm8  ;;  %1758 = vmatpush.msrb.mxu2 %v1731_v54 }
 0x976   : > { %v1640_v58 = vsub.f32 1.0, %v1639_v57 }
 0x978   : > { %v1641_v60 = vmul.f32 %v2646_v56, %v1640_v58 }
 0x97a   : > { %v1642_v63 = vadd.f32 %v2646_v56, %v1641_v60 }
 0x97c   : > { %v1646_v0 = vsel %vm1645_vm9, %v2646_v56, %v1642_v63  ;;  %v1729_v56 = vld [vmem:[#allocation6] sm:$0xff] }
 0x97d   : > { %v1651_v1 = vsel %vm1648_vm14, %v1650_v20, %v1646_v0 }
 0x97e   : > { %v1652_v3 = vmul.f32 %v2642_v35, %v1651_v1 }
 0x980   : > { %2484 = vmatmul.msk.f32.vlgmr.msra.gmra.mxu1 %vm804_vm3, %v1652_v3  ;;  %v1725_v3 = vperm.slane %v3288_v2, 5 }
 0x9d6   : > { %v1265_v15 = vpop.xlane.xlu2 %1264 }
 0x9d7   : > { %v1266_v55 = vmul.f32 %v1265_v15, %v3312_v36 }
 0x9d9   : > { %v1267_v16 = vadd.f32 1e-05, %v1266_v55 }
 0x9db   : > { %2647 = vrsqrt.f32 %v1267_v16  ;;  %vm1274_vm4 = vweird.f32 %v1267_v16 }
 0x9e1   : > { %v2648_v19 = vpop.eup %2647 }
 0x9e2   : > { %v1269_v21 = vmul.f32 %v2648_v19, %v1267_v16  ;;  %vm1275_vm15 = vweird.f32 %v2648_v19 }
 0x9e3   : > { %vm1276_vm6 = vmor %vm1274_vm4, %vm1275_vm15 }
 0x9e4   : > { %v1270_v23 = vmul.f32 %v2648_v19, %v1269_v21  ;;  %v1790_v21 = vperm.slane %v3453_v41, 1 }
 0x9e6   : > { %v1271_v27 = vmul.f32 0.5, %v1270_v23 }
 0x9e8   : > { %v1272_v29 = vsub.f32 1.5, %v1271_v27 }
 0x9ea   : > { %v1273_v30 = vmul.f32 %v2648_v19, %v1272_v29  ;;  %v1595_v35 = vpop.f32.mrf.mxu2 }
 0x9eb   : > { %v1598_v38 = vadd.f32 %v1595_v35, %v1518_v37 }
 0x9ec   : > { %v1277_v31 = vsel %vm1276_vm6, %v2648_v19, %v1273_v30 }
 0x9ed   : > { %v1278_v33 = vmul.f32 %v1277_v31, %v3427_v45 }
 0x9ef   : > { %v1280_v34 = vmul.f32 %v1279_v11, %v1278_v33 }
 0x9f1   : > { %v1282_v7 = vadd.f32 %v1281_v32, %v1280_v34 }
 0x9f3   : > { %2487 = vmatmul.msk.f32.vlgmr.msra.gmra.mxu3 %vm761_vm2, %v1282_v7 }
 0x9fd   : > { %v1674_v39 = vpop.f32.mrf.mxu1 }
 0x9fe   : > { %v1677_v40 = vadd.f32 %v1674_v39, %v1598_v38 }
 0xa00   : > { %2485 = vmatmul.msk.f32.vlgmr.msrb.gmra.mxu0 %vm761_vm2, %v1677_v40 }
 0xa76   : > { %v3456_v9 = vpop.f32.mrf.mxu3 }
 0xa77   : > { %v1789_v43 = vadd.f32 %v1788_v42, %v3456_v9 }
 0xa79   : > { %2488 = vmatpush.xpose.msk.msrb.mxu1 %vm804_vm3, %v1789_v43 }
 0xa7d   : > { %v1699_v45 = vpop.f32.mrf.mxu0 }
 0xa7e   : > { %v1700_v46 = vadd.f32 %v1699_v45, %v1678_v44 }
 0xa80   : > { %v1702_v62 = vadd.f32 %v1700_v46, %v3294_v14  ;;  %v1730_v14 = vld [vmem:[#allocation6 + $0x8] sm:$0xff] }
 0xa81   : > { %1759 = vmatpush.msrb.mxu2 %v1730_v14 }
 0xa82   : > { %v1703_v28 = vsel %vm761_vm2, %v1702_v62, 0.0 }
 0xa83   : > { %1704 = vadd.xlane.f32.xlu1 %v1703_v28  ;;  %1760 = vmatpush.msrb.mxu2 %v1729_v56 }
 0xa9c   : > { %1854 = vrot.lane.b32.xlu1 %v1789_v43, %s2952_s19 }
 0xaf6   : > { %v1705_v47 = vpop.xlane.xlu1 %1704 }
 0xaf7   : > { %v1706_v48 = vmul.f32 %v1705_v47, %v3312_v36 }
 0xaf9   : > { %v1707_v49 = vsub.f32 %v1702_v62, %v1706_v48 }
 0xafb   : > { %v1708_v50 = vmul.f32 %v1707_v49, %v1707_v49 }
 0xafd   : > { %v1709_v51 = vsel %vm761_vm2, %v1708_v50, 0.0 }
 0xafe   : > { %1710 = vadd.xlane.f32.xlu0 %v1709_v51 }
 0xb0e   : > { %v1855_v52 = vpop.permute.xlu1 %1854 }
 0xb0f   : > { %2490 = vmatpush.xpose.msk.msra.mxu0 %vm804_vm3, %v1855_v52 }
 0xb71   : > { %v1711_v57 = vpop.xlane.xlu0 %1710 }
 0xb72   : > { %v1712_v58 = vmul.f32 %v1711_v57, %v3312_v36 }
 0xb74   : > { %v1713_v59 = vadd.f32 1e-05, %v1712_v58 }
 0xb76   : > { %2649 = vrsqrt.f32 %v1713_v59  ;;  %vm1720_vm7 = vweird.f32 %v1713_v59 }
 0xb7c   : > { %v2650_v60 = vpop.eup %2649 }
 0xb7d   : > { %v1715_v61 = vmul.f32 %v2650_v60, %v1713_v59  ;;  %vm1721_vm0 = vweird.f32 %v2650_v60 }
 0xb7e   : > { %vm1722_vm8 = vmor %vm1720_vm7, %vm1721_vm0 }
 0xb7f   : > { %v1716_v63 = vmul.f32 %v2650_v60, %v1715_v61 }
 0xb81   : > { %v1717_v20 = vmul.f32 0.5, %v1716_v63 }
 0xb83   : > { %v1718_v0 = vsub.f32 1.5, %v1717_v20 }
 0xb85   : > { %v1719_v1 = vmul.f32 %v2650_v60, %v1718_v0 }
 0xb87   : > { %v1723_v4 = vsel %vm1722_vm8, %v2650_v60, %v1719_v1 }
 0xb88   : > { %v1724_v5 = vmul.f32 %v1723_v4, %v1707_v49 }
 0xb8a   : > { %v1726_v10 = vmul.f32 %v1725_v3, %v1724_v5 }
 0xb8c   : > { %v3470_v12 = vadd.f32 %v1727_v8, %v1726_v10 }
 0xb8e   : > { %2486 = vmatmul.msk.f32.vlgmr.msrb.gmra.mxu2 %vm761_vm2, %v3470_v12 }
 0xc11   : > { %v1762_v15 = vpop.f32.mrf.mxu2 }
 0xc12   : > { %v1763_v55 = vadd.f32 %v1762_v15, %v1741_v13 }
 0xc14   : > { %1852 = vrot.lane.b32.xlu2 %v1763_v55, %s2952_s19  ;;  %2489 = vmatmul.msk.f32.vlgmr.msrb.gmra.mxu1 %vm804_vm3, %v1763_v55  ;;  %s716_s19 = scalar_lea.vmem %s3581_s18, %s3159_s14 }
 0xc6e   : > { %v1853_v16 = vpop.permute.xlu2 %1852 }
 0xc6f   : > { %2491 = vmatmul.msk.f32.vlgmr.msra.gmra.mxu0 %vm804_vm3, %v1853_v16 }
 0xc91   : > { %v1819_v2 = vpop.f32.mrf.mxu1 }
 0xc92   : > { %v1822_v23 = vmul.f32 0.35355338, %v1819_v2 }
 0xc94   : > { %v1823_v27 = vsel %vm804_vm3, %v1822_v23, -inf }
 0xcec   : > { %v1877_v17 = vpop.f32.mrf.mxu0 }
 0xced   : > { %v1880_v18 = vmul.f32 0.35355338, %v1877_v17 }
 0xcef   : > { %v1881_v19 = vsel %vm804_vm3, %v1880_v18, -inf }
 0xcf0   : > { %1882 = vmax.xlane.f32.xlu0 %v1881_v19 }
 0xd04   : > { %1792 = vrot.lane.b32.xlu0 %v1790_v21, %s2949_s28 }
 0xd0c   : > { %2032 = vrot.lane.b32.xlu0 %v1789_v43, %s3610_s21 }
 0xd14   : > { %1954 = vrot.lane.b32.xlu0 %v1789_v43, %s3611_s30 }
 0xd3e   : > { %1824 = vmax.xlane.f32.xlu0 %v1823_v27 }
 0xd63   : > { %v1883_v29 = vpop.xlane.xlu0 %1882 }
 0xd64   : > { %v1884_v30 = vsub.f32 %v1880_v18, %v1883_v29 }
 0xd66   : > { %v1885_v11 = vmul.f32 1.442695, %v1884_v30 }
 0xd68   : > { %2651 = vpow2.f32 %v1885_v11 }
 0xd6e   : > { %v2652_v31 = vpop.eup %2651 }
 0xd6f   : > { %v1887_v32 = vsel %vm804_vm3, %v2652_v31, 0.0 }
 0xd70   : > { %1888 = vadd.xlane.f32.xlu1 %v1887_v32 }
 0xd76   : > { %v1793_v33 = vpop.permute.xlu0 %1792 }
 0xd77   : > { %v1795_v34 = vadd.f32 %v1793_v33, %v3456_v9 }
 0xd79   : > { %1848 = vrot.lane.b32.xlu2 %v1795_v34, %s2953_s23 }
 0xd7e   : > { %v2033_v7 = vpop.permute.xlu0 %2032 }
 0xd81   : > { %2030 = vrot.lane.b32.xlu2 %v1763_v55, %s3610_s21 }
 0xd86   : > { %v1955_v6 = vpop.permute.xlu0 %1954 }
 0xd87   : > { %2496 = vmatpush.xpose.msk.msra.mxu1 %vm804_vm3, %v1955_v6 }
 0xd89   : > { %1952 = vrot.lane.b32.xlu2 %v1763_v55, %s3611_s30 }
 0xdb1   : > { %v1825_v62 = vpop.xlane.xlu0 %1824 }
 0xdb2   : > { %v1826_v28 = vsub.f32 %v1822_v23, %v1825_v62  ;;  %v1737_v62 = vld [vmem:[#allocation9] sm:$0xff] }
 0xdb4   : > { %v1827_v47 = vmul.f32 1.442695, %v1826_v28 }
 0xdd3   : > { %v1849_v35 = vpop.permute.xlu2 %1848 }
 0xdd4   : > { %2492 = vmatpush.msk.msra.mxu2 %vm3219_vm10, %v1849_v35  ;;  %2494 = vmatpush.msk.msrb.mxu3 %vm856_vm11, %v1849_v35 }
 0xdd5   : > { %2498 = vmatpush.msk.msrb.mxu0 %vm3224_vm12, %v1849_v35 }
 0xdd6   : > { %2500 = vmatpush.xpose.msk.msrb.mxu2 %vm804_vm3, %v2033_v7  ;;  %2502 = vmatpush.msk.msra.mxu3 %vm3228_vm13, %v1849_v35 }
 0xddb   : > { %v2031_v37 = vpop.permute.xlu2 %2030 }
 0xde3   : > { %v1889_v38 = vpop.xlane.xlu1 %1888  ;;  %v1953_v39 = vpop.permute.xlu2 %1952 }
 0xde4   : > { %2653 = vrcp.f32 %v1889_v38  ;;  %2497 = vmatmul.msk.f32.vlgmr.msra.gmra.mxu1 %vm804_vm3, %v1953_v39  ;;  %v1901_v9 = vand.u32 2147483648, %v1889_v38  ;;  %v1899_v43 = vand.u32 2147483647, %v1889_v38  ;;  %vm1895_vm11 = vweird.f32 %v1889_v38 }
 0xde5   : > { %2655 = vpow2.f32 %v1827_v47 }
 0xde6   : > { %v1902_v44 = vor.u32 1.1754944e-38, %v1901_v9  ;;  %vm1900_vm1 = vcmp.eq.f32.partialorder %v1899_v43, 8.507059e+37 }
 0xdea   : > { %v2654_v40 = vpop.eup %2653 }
 0xdeb   : > { %v1891_v24 = vmul.f32 %v2654_v40, %v1889_v38  ;;  %vm1896_vm10 = vweird.f32 %v2654_v40  ;;  %v2656_v51 = vpop.eup %2655 }
 0xdec   : > { %vm1897_vm12 = vmor %vm1895_vm11, %vm1896_vm10  ;;  %v1829_v52 = vsel %vm804_vm3, %v2656_v51, 0.0 }
 0xded   : > { %v1892_v42 = vsub.f32 1.0, %v1891_v24 }
 0xdef   : > { %v1893_v22 = vmul.f32 %v2654_v40, %v1892_v42 }
 0xdf1   : > { %v1894_v25 = vadd.f32 %v2654_v40, %v1893_v22 }
 0xdf3   : > { %v1898_v45 = vsel %vm1897_vm12, %v2654_v40, %v1894_v25 }
 0xdf4   : > { %v1903_v26 = vsel %vm1900_vm1, %v1902_v44, %v1898_v45  ;;  %v1740_v45 = vld [vmem:[#allocation9 + $0x18] sm:$0xff] }
 0xdf5   : > { %v1904_v46 = vmul.f32 %v2652_v31, %v1903_v26  ;;  %2124 = vmatpush.msrb.mxu1 %v1740_v45  ;;  %v1739_v26 = vld [vmem:[#allocation9 + $0x10] sm:$0xff] }
 0xdf6   : > { %v2249_v45 = vld [vmem:[#allocation12 + $0x10] sm:$0xff] }
 0xdf7   : > { %2493 = vmatmul.msk.f32.vlgmr.msra.gmra.mxu2 %vm804_vm3, %v1904_v46  ;;  %2125 = vmatpush.msrb.mxu1 %v1739_v26  ;;  %v1738_v46 = vld [vmem:[#allocation9 + $0x8] sm:$0xff] }
 0xdf8   : > { %v2248_v26 = vld [vmem:[#allocation12 + $0x8] sm:$0xff] }
 0xdf9   : > { %2126 = vmatpush.msrb.mxu1 %v1738_v46  ;;  %v2247_v46 = vld [vmem:[#allocation12] sm:$0xff] }
 0xdfb   : > { %2127 = vmatpush.msrb.mxu1 %v1737_v62 }
 0xdff   : > { %2501 = vmatmul.msk.f32.vlgmr.msrb.gmra.mxu2 %vm804_vm3, %v2031_v37 }
 0xe61   : > { %v1977_v48 = vpop.f32.mrf.mxu1 }
 0xe62   : > { %v1980_v49 = vmul.f32 0.35355338, %v1977_v48 }
 0xe64   : > { %v1981_v50 = vsel %vm804_vm3, %v1980_v49, -inf }
 0xe65   : > { %1982 = vmax.xlane.f32.xlu1 %v1981_v50 }
 0xe6d   : > { %1830 = vadd.xlane.f32.xlu1 %v1829_v52  ;;  %v2108_v52 = vperm.slane %v3453_v41, 2 }
 0xe7a   : > { %v3504_v53 = vpop.f32.mrf.mxu2 }
 0xe82   : > { %v2055_v54 = vpop.f32.mrf.mxu2 }
 0xe83   : > { %v2058_v14 = vmul.f32 0.35355338, %v2055_v54 }
 0xe85   : > { %v2059_v56 = vsel %vm804_vm3, %v2058_v14, -inf }
 0xe86   : > { %2060 = vmax.xlane.f32.xlu2 %v2059_v56 }
 0xed8   : > { %v1983_v57 = vpop.xlane.xlu1 %1982 }
 0xed9   : > { %v1984_v15 = vsub.f32 %v1980_v49, %v1983_v57 }
 0xedb   : > { %v1985_v16 = vmul.f32 1.442695, %v1984_v15  ;;  %v2166_v15 = vld [vmem:[%s3578_s15 + $0x18] sm:$0xff] }
 0xee0   : > { %v1831_v58 = vpop.xlane.xlu1 %1830 }
 0xee1   : > { %2657 = vrcp.f32 %v1831_v58  ;;  %v1843_v63 = vand.u32 2147483648, %v1831_v58  ;;  %v1841_v0 = vand.u32 2147483647, %v1831_v58  ;;  %vm1837_vm9 = vweird.f32 %v1831_v58 }
 0xee3   : > { %v1844_v3 = vor.u32 1.1754944e-38, %v1843_v63  ;;  %vm1842_vm15 = vcmp.eq.f32.partialorder %v1841_v0, 8.507059e+37  ;;  %v2162_v63 = vld [vmem:[#allocation10 + $0x18] sm:$0xff]  ;;  %v2160_v0 = vld [vmem:[#allocation10 + $0x8] sm:$0xff] }
 0xee4   : > { %2187 = vmatpush.msra.mxu0 %v2162_v63 }
 0xee7   : > { %v2658_v59 = vpop.eup %2657 }
 0xee8   : > { %v1833_v60 = vmul.f32 %v2658_v59, %v1831_v58  ;;  %vm1838_vm13 = vweird.f32 %v2658_v59 }
 0xee9   : > { %vm1839_vm14 = vmor %vm1837_vm9, %vm1838_vm13 }
 0xeea   : > { %v1834_v61 = vsub.f32 1.0, %v1833_v60 }
 0xeec   : > { %v1835_v20 = vmul.f32 %v2658_v59, %v1834_v61 }
 0xeee   : > { %v1836_v1 = vadd.f32 %v2658_v59, %v1835_v20  ;;  %v2161_v20 = vld [vmem:[#allocation10 + $0x10] sm:$0xff] }
 0xeef   : > { %2188 = vmatpush.msra.mxu0 %v2161_v20 }
 0xef0   : > { %v1840_v4 = vsel %vm1839_vm14, %v2658_v59, %v1836_v1  ;;  %v2159_v1 = vld [vmem:[#allocation10] sm:$0xff] }
 0xef1   : > { %v1845_v5 = vsel %vm1842_vm15, %v1844_v3, %v1840_v4  ;;  %2189 = vmatpush.msra.mxu0 %v2160_v0  ;;  %v2169_v3 = vld [vmem:[%s3578_s15 + $0x30] sm:$0xff]  ;;  %v2168_v4 = vld [vmem:[%s3578_s15 + $0x28] sm:$0xff] }
 0xef2   : > { %v1846_v8 = vmul.f32 %v2656_v51, %v1845_v5 }
 0xef3   : > { %2190 = vmatpush.msra.mxu0 %v2159_v1 }
 0xef4   : > { %2495 = vmatmul.msk.f32.vlgmr.msrb.gmra.mxu3 %vm804_vm3, %v1846_v8 }
 0xef9   : > { %v2061_v10 = vpop.xlane.xlu2 %2060 }
 0xefa   : > { %v2062_v13 = vsub.f32 %v2058_v14, %v2061_v10  ;;  %v2167_v10 = vld [vmem:[%s3578_s15 + $0x20] sm:$0xff] }
 0xefc   : > { %v2063_v55 = vmul.f32 1.442695, %v2062_v13 }
 0xefe   : > { %2659 = vpow2.f32 %v2063_v55 }
 0xeff   : > { %2661 = vpow2.f32 %v1985_v16 }
 0xf04   : > { %v2660_v17 = vpop.eup %2659 }
 0xf05   : > { %v2065_v18 = vsel %vm804_vm3, %v2660_v17, 0.0  ;;  %v2662_v19 = vpop.eup %2661 }
 0xf06   : > { %2066 = vadd.xlane.f32.xlu1 %v2065_v18  ;;  %v1987_v21 = vsel %vm804_vm3, %v2662_v19, 0.0 }
 0xf0e   : > { %1988 = vadd.xlane.f32.xlu1 %v1987_v21 }
 0xf77   : > { %v1949_v28 = vpop.f32.mrf.mxu3 }
 0xf78   : > { %v1950_v47 = vadd.f32 %v1949_v28, %v3504_v53 }
 0xf79   : > { %v2067_v2 = vpop.xlane.xlu1 %2066 }
 0xf7a   : > { %2663 = vrcp.f32 %v2067_v2  ;;  %v2079_v11 = vand.u32 2147483648, %v2067_v2  ;;  %v2077_v32 = vand.u32 2147483647, %v2067_v2  ;;  %vm2073_vm6 = vweird.f32 %v2067_v2 }
 0xf7c   : > { %v2080_v7 = vor.u32 1.1754944e-38, %v2079_v11  ;;  %vm2078_vm7 = vcmp.eq.f32.partialorder %v2077_v32, 8.507059e+37  ;;  %v2164_v32 = vld [vmem:[%s3578_s15 + $0x8] sm:$0xff] }
 0xf80   : > { %v2664_v23 = vpop.eup %2663 }
 0xf81   : > { %v2069_v27 = vmul.f32 %v2664_v23, %v2067_v2  ;;  %v1989_v29 = vpop.xlane.xlu1 %1988  ;;  %vm2074_vm4 = vweird.f32 %v2664_v23  ;;  %v2155_v2 = vperm.slane %v3453_v41, 3 }
 0xf82   : > { %2665 = vrcp.f32 %v1989_v29  ;;  %vm2075_vm0 = vmor %vm2073_vm6, %vm2074_vm4  ;;  %v2001_v40 = vand.u32 2147483648, %v1989_v29  ;;  %v1999_v42 = vand.u32 2147483647, %v1989_v29  ;;  %vm1995_vm10 = vweird.f32 %v1989_v29 }
 0xf83   : > { %v2070_v30 = vsub.f32 1.0, %v2069_v27 }
 0xf84   : > { %v2002_v22 = vor.u32 1.1754944e-38, %v2001_v40  ;;  %vm2000_vm12 = vcmp.eq.f32.partialorder %v1999_v42, 8.507059e+37 }
 0xf85   : > { %v2071_v31 = vmul.f32 %v2664_v23, %v2070_v30 }
 0xf87   : > { %v2072_v33 = vadd.f32 %v2664_v23, %v2071_v31  ;;  %v2165_v31 = vld [vmem:[%s3578_s15 + $0x10] sm:$0xff] }
 0xf88   : > { %v2666_v34 = vpop.eup %2665 }
 0xf89   : > { %v2076_v6 = vsel %vm2075_vm0, %v2664_v23, %v2072_v33  ;;  %v1991_v35 = vmul.f32 %v2666_v34, %v1989_v29  ;;  %vm1996_vm8 = vweird.f32 %v2666_v34  ;;  %v2157_v29 = vperm.slane %v3453_v41, 4  ;;  %v2163_v33 = vld [vmem:[%s3578_s15] sm:$0xff] }
 0xf8a   : > { %v2081_v37 = vsel %vm2078_vm7, %v2080_v7, %v2076_v6  ;;  %vm1997_vm11 = vmor %vm1995_vm10, %vm1996_vm8 }
 0xf8b   : > { %v1992_v38 = vsub.f32 1.0, %v1991_v35  ;;  %v2082_v39 = vmul.f32 %v2660_v17, %v2081_v37  ;;  %v2196_v37 = vperm.slane %v3453_v41, 6 }
 0xf8d   : > { %v1993_v24 = vmul.f32 %v2666_v34, %v1992_v38  ;;  %2503 = vmatmul.msk.f32.vlgmr.msra.gmra.mxu3 %vm804_vm3, %v2082_v39 }
 0xf8f   : > { %v1994_v9 = vadd.f32 %v2666_v34, %v1993_v24 }
 0xf91   : > { %v1998_v43 = vsel %vm1997_vm11, %v2666_v34, %v1994_v9  ;;  %v2171_v34 = vperm.slane %v3453_v41, 5 }
 0xf92   : > { %v2003_v25 = vsel %vm2000_vm12, %v2002_v22, %v1998_v43 }
 0xf93   : > { %v2004_v44 = vmul.f32 %v2662_v19, %v2003_v25 }
 0xf95   : > { %2499 = vmatmul.msk.f32.vlgmr.msrb.gmra.mxu0 %vm804_vm3, %v2004_v44  ;;  %v2250_v44 = vld [vmem:[#allocation12 + $0x18] sm:$0xff] }
 0xf96   : > { %2267 = vmatpush.msrb.mxu3 %v2250_v44 }
 0xf98   : > { %2268 = vmatpush.msrb.mxu3 %v2249_v45 }
 0xf9a   : > { %2269 = vmatpush.msrb.mxu3 %v2248_v26 }
 0xf9c   : > { %2270 = vmatpush.msrb.mxu3 %v2247_v46 }
0x1010   : > { %v2104_v50 = vpop.f32.mrf.mxu3 }
0x1012   : > { %v2026_v48 = vpop.f32.mrf.mxu0 }
0x1013   : > { %v2029_v49 = vadd.f32 %v2026_v48, %v1950_v47 }
0x1015   : > { %v2107_v51 = vadd.f32 %v2104_v50, %v2029_v49 }
0x1017   : > { %2504 = vmatmul.msk.f32.vlgmr.msrb.gmra.mxu1 %vm761_vm2, %v2107_v51 }
0x1094   : > { %v2129_v54 = vpop.f32.mrf.mxu1 }
0x1095   : > { %v2130_v14 = vadd.f32 %v2129_v54, %v2108_v52 }
0x1097   : > { %v2132_v56 = vadd.f32 %v2130_v14, %v3470_v12  ;;  %v2170_v12 = vld [vmem:[%s3578_s15 + $0x38] sm:$0xff] }
0x1098   : > { %2208 = vmatpush.msra.mxu2 %v2170_v12  ;;  %v721_v14 = vld [vmem:[#allocation13 + $0x10] sm:$0x3] }
0x1099   : > { %v2133_v57 = vsel %vm761_vm2, %v2132_v56, 0.0 }
0x109a   : > { %2134 = vadd.xlane.f32.xlu0 %v2133_v57  ;;  %2209 = vmatpush.msra.mxu2 %v2169_v3 }
0x109c   : > { %2210 = vmatpush.msra.mxu2 %v2168_v4 }
0x109e   : > { %2211 = vmatpush.msra.mxu2 %v2167_v10 }
0x10a0   : > { %2212 = vmatpush.msra.mxu2 %v2166_v15 }
0x10a2   : > { %2213 = vmatpush.msra.mxu2 %v2165_v31 }
0x10a4   : > { %2214 = vmatpush.msra.mxu2 %v2164_v32 }
0x10a6   : > { %2215 = vmatpush.msra.mxu2 %v2163_v33 }
0x110d   : > { %v2135_v58 = vpop.xlane.xlu0 %2134 }
0x110e   : > { %v2136_v59 = vmul.f32 %v2135_v58, %v3312_v36 }
0x1110   : > { %v2137_v60 = vsub.f32 %v2132_v56, %v2136_v59  ;;  %v2243_v56 = vperm.slane %v3453_v41, 7  ;;  %v2245_v59 = vperm.slane %v721_v14, 0 }
0x1112   : > { %v2138_v53 = vmul.f32 %v2137_v60, %v2137_v60 }
0x1114   : > { %v2139_v61 = vsel %vm761_vm2, %v2138_v53, 0.0  ;;  %v2251_v53 = vperm.slane %v721_v14, 1 }
0x1115   : > { %2140 = vadd.xlane.f32.xlu2 %v2139_v61 }
0x1188   : > { %v2141_v5 = vpop.xlane.xlu2 %2140 }
0x1189   : > { %v2142_v8 = vmul.f32 %v2141_v5, %v3312_v36 }
0x118b   : > { %v2143_v13 = vadd.f32 1e-05, %v2142_v8 }
0x118d   : > { %2667 = vrsqrt.f32 %v2143_v13  ;;  %vm2150_vm1 = vweird.f32 %v2143_v13 }
0x1193   : > { %v2668_v55 = vpop.eup %2667 }
0x1194   : > { %v2145_v16 = vmul.f32 %v2668_v55, %v2143_v13  ;;  %vm2151_vm3 = vweird.f32 %v2668_v55 }
0x1195   : > { %vm2152_vm13 = vmor %vm2150_vm1, %vm2151_vm3 }
0x1196   : > { %v2146_v17 = vmul.f32 %v2668_v55, %v2145_v16 }
0x1198   : > { %v2147_v18 = vmul.f32 0.5, %v2146_v17 }
0x119a   : > { %v2148_v19 = vsub.f32 1.5, %v2147_v18 }
0x119c   : > { %v2149_v21 = vmul.f32 %v2668_v55, %v2148_v19 }
0x119e   : > { %v2153_v23 = vsel %vm2152_vm13, %v2668_v55, %v2149_v21 }
0x119f   : > { %v2154_v27 = vmul.f32 %v2153_v23, %v2137_v60 }
0x11a1   : > { %v2156_v30 = vmul.f32 %v2155_v2, %v2154_v27 }
0x11a3   : > { %v2158_v11 = vadd.f32 %v2157_v29, %v2156_v30 }
0x11a5   : > { %2505 = vmatmul.msk.f32.vlgmr.msra.gmra.mxu0 %vm761_vm2, %v2158_v11 }
0x1222   : > { %v2192_v7 = vpop.f32.mrf.mxu0 }
0x1223   : > { %v2193_v6 = vadd.f32 %v2192_v7, %v2171_v34 }
0x1225   : > { %v2195_v35 = vmax.f32 %v2193_v6, 0.0 }
0x1227   : > { %2506 = vmatmul.msk.f32.vlgmr.msra.gmra.mxu2 %vm1232_vm5, %v2195_v35 }
0x12aa   : > { %v2217_v38 = vpop.f32.mrf.mxu2 }
0x12ab   : > { %v2218_v39 = vadd.f32 %v2217_v38, %v2196_v37 }
0x12ad   : > { %v2220_v40 = vadd.f32 %v2218_v39, %v2158_v11 }
0x12af   : > { %v2221_v24 = vsel %vm761_vm2, %v2220_v40, 0.0 }
0x12b0   : > { %2222 = vadd.xlane.f32.xlu1 %v2221_v24 }
0x1323   : > { %v2223_v42 = vpop.xlane.xlu1 %2222 }
0x1324   : > { %v2224_v9 = vmul.f32 %v2223_v42, %v3312_v36 }
0x1326   : > { %v2225_v22 = vsub.f32 %v2220_v40, %v2224_v9 }
0x1328   : > { %v2226_v43 = vmul.f32 %v2225_v22, %v2225_v22 }
0x132a   : > { %v2227_v25 = vsel %vm761_vm2, %v2226_v43, 0.0 }
0x132b   : > { %2228 = vadd.xlane.f32.xlu0 %v2227_v25 }
0x139e   : > { %v2229_v62 = vpop.xlane.xlu0 %2228 }
0x139f   : > { %v2230_v28 = vmul.f32 %v2229_v62, %v3312_v36 }
0x13a1   : > { %v2231_v47 = vadd.f32 1e-05, %v2230_v28 }
0x13a3   : > { %2669 = vrsqrt.f32 %v2231_v47  ;;  %vm2238_vm9 = vweird.f32 %v2231_v47 }
0x13a9   : > { %v2670_v48 = vpop.eup %2669 }
0x13aa   : > { %v2233_v49 = vmul.f32 %v2670_v48, %v2231_v47  ;;  %vm2239_vm5 = vweird.f32 %v2670_v48 }
0x13ab   : > { %vm2240_vm14 = vmor %vm2238_vm9, %vm2239_vm5 }
0x13ac   : > { %v2234_v50 = vmul.f32 %v2670_v48, %v2233_v49 }
0x13ae   : > { %v2235_v51 = vmul.f32 0.5, %v2234_v50 }
0x13b0   : > { %v2236_v52 = vsub.f32 1.5, %v2235_v51 }
0x13b2   : > { %v2237_v54 = vmul.f32 %v2670_v48, %v2236_v52 }
0x13b4   : > { %v2241_v57 = vsel %vm2240_vm14, %v2670_v48, %v2237_v54 }
0x13b5   : > { %v2242_v58 = vmul.f32 %v2241_v57, %v2225_v22 }
0x13b7   : > { %v2244_v60 = vmul.f32 %v2243_v56, %v2242_v58 }
0x13b9   : > { %v2246_v36 = vadd.f32 %v2245_v59, %v2244_v60 }
0x13bb   : > { %2507 = vmatmul.msk.f32.vlgmr.msrb.gmra.mxu3 %vm761_vm2, %v2246_v36 }
0x143e   : > { %v2272_v61 = vpop.f32.mrf.mxu3 }
0x143f   : > { %v2273_v63 = vadd.f32 %v2272_v61, %v2251_v53 }
0x1441   : > { %2275 = vst [vmem:[%s716_s19] sm:$0xff] %v2273_v63 }
0x1442 PF: > { %s3612_s23 = sld [smem:[#allocation20_spill]] }
0x1448   : > { %s33_s27 = sadd.s32 1, %s3612_s23  }
0x1449   : > { %p30_p7 = scmp.ge.s32.totalorder %s33_s27, 4  }
0x144b   :  { %32 = sbr.rel (!%p30_p7) target bundleno = 12 (0xc), region = 158 }
0x1450   :  { %2295 = vsyncpa [#allocation3], 1 }
0x1451   :  { %2297 = vsyncpa [#allocation3 + $0x1], 1 }
0x1452   :  { %2298 = vsyncpa [#allocation5], 1 }
0x1453   :  { %2299 = vsyncpa [#allocation8], 1 }
0x1454   :  { %2300 = vsyncpa [#allocation11], 1 }
0x1455   :  { %2301 = vsyncpa [#allocation14], 1 }

</bundles_post_ra>
